<compile_context>
chip_gen: v7x
topology: tpu7x:2x2x1
jax: 0.10.0
libtpu: 0.0.40
codegen_flags: <defaults>
</compile_context>

<pallas_src>
import functools

import jax
import jax.numpy as jnp
import numpy as np
from jax.experimental import pallas as pl
from jax.experimental.pallas import tpu as pltpu


def _layer1_kernel(a_ref, x_ref, w_ref, b1_ref, hw_ref, acc_ref, deg_ref, *,
                   num_rel):
    """Layer 1 (weight=False GraphConv) + per-relation weight projection.

    grid = (dst_tiles [parallel], src_tiles [reduction]).

    a_ref:   [R, TD, TS] int8   adjacency tile (A[r, dst, src])
    x_ref:   [TS, Dp]    bf16   node-feature src tile (lane padded)
    w_ref:   [Dp, R*Op]  bf16   layer-2 weights, relations concatenated on lanes
    b1_ref:  [1, Dp]     f32    layer-1 bias
    hw_ref:  [TD, R*Op]  bf16   OUT: relu(layer1) @ W_r for every relation
    acc_ref: [R, TD, Dp] f32    per-relation aggregation accumulator (scratch)
    deg_ref: [R, TD, 1]  f32    per-relation in-degree accumulator   (scratch)
    """
    s = pl.program_id(1)

    @pl.when(s == 0)
    def _():
        acc_ref[...] = jnp.zeros_like(acc_ref)
        deg_ref[...] = jnp.zeros_like(deg_ref)

    x = x_ref[...]                                     # [TS, Dp] bf16
    for r in range(num_rel):                           # R tiny -> static unroll
        a_r = a_ref[r].astype(jnp.float32)             # int8 -> f32 (exact 0/1)
        # in-degree = row-sum of A, computed while the tile is already in VMEM
        deg_ref[r] += jnp.sum(a_r, axis=-1, keepdims=True)
        acc_ref[r] += jnp.dot(a_r.astype(jnp.bfloat16), x,
                              preferred_element_type=jnp.float32)

    @pl.when(s == pl.num_programs(1) - 1)
    def _():
        h = jnp.zeros(acc_ref.shape[1:], jnp.float32)          # [TD, Dp]
        for r in range(num_rel):
            inv = 1.0 / jnp.maximum(deg_ref[r], 1.0)           # norm='right'
            h += acc_ref[r] * inv
        h1 = jnp.maximum(h + b1_ref[...], 0.0).astype(jnp.bfloat16)
        # project through all relation weights at once; h1 never leaves VMEM
        hw_ref[...] = jnp.dot(h1, w_ref[...],
                              preferred_element_type=jnp.float32
                              ).astype(hw_ref.dtype)


def _layer2_kernel(a_ref, hw_ref, b2_ref, o_ref, acc_ref, deg_ref, *,
                   num_rel, o_pad):
    """Layer 2 aggregation: out = sum_r (A_r @ (h1 @ W_r)) / clamp(deg_r,1) + b2.

    a_ref:   [R, TD, TS]  int8
    hw_ref:  [TS, R*Op]   bf16   projected src features from kernel 1
    b2_ref:  [1, Op]      f32
    o_ref:   [TD, Op]     f32
    acc_ref: [R, TD, Op]  f32    scratch
    deg_ref: [R, TD, 1]   f32    scratch
    """
    s = pl.program_id(1)

    @pl.when(s == 0)
    def _():
        acc_ref[...] = jnp.zeros_like(acc_ref)
        deg_ref[...] = jnp.zeros_like(deg_ref)

    for r in range(num_rel):
        a_r = a_ref[r].astype(jnp.float32)
        deg_ref[r] += jnp.sum(a_r, axis=-1, keepdims=True)
        hw_r = hw_ref[:, r * o_pad:(r + 1) * o_pad]            # [TS, Op] bf16
        acc_ref[r] += jnp.dot(a_r.astype(jnp.bfloat16), hw_r,
                              preferred_element_type=jnp.float32)

    @pl.when(s == pl.num_programs(1) - 1)
    def _():
        out = jnp.zeros(o_ref.shape, jnp.float32)
        for r in range(num_rel):
            inv = 1.0 / jnp.maximum(deg_ref[r], 1.0)
            out += acc_ref[r] * inv
        o_ref[...] = (out + b2_ref[...]).astype(o_ref.dtype)


def _round_up(x, m):
    return ((x + m - 1) // m) * m


def entity_classify_forward(a, x, params, *, dst_tile=512, src_tile=512):
    """EntityClassify.forward with h=None, blocks=None (full dense graph).

    a: [R, N, N] adjacency (int8 preferred, 0/1).  x: [N, D_in] node features.
    params: bias1 [D_in], bias2 [D_out], w2 [R, D_in, D_out].
    """
    num_rel, n, _ = a.shape
    d_in = x.shape[1]
    d_out = params["w2"].shape[2]
    lane = 128

    d_pad = _round_up(d_in, lane)
    o_pad = _round_up(d_out, lane)

    # --- tile sizes (clamped for small graphs). Defaults (512, 512) keep total
    # VMEM use around ~4 MiB -> big headroom vs v7x's 64 MiB; raise on
    # v5e/v6e (128 MiB VMEM) to amortize per-step overhead further.
    ts = min(src_tile, _round_up(n, lane))
    td = min(dst_tile, ts)
    ts = _round_up(ts, td)           # keep td | ts
    np_ = _round_up(n, ts)           # td | ts | np_
    grid = (np_ // td, np_ // ts)    # (dst tiles [parallel], src tiles [reduction])

    # --- operand prep (all non-A tensors are O(N*128) or smaller).
    # A streams straight from HBM as int8; bf16 widening and the degree row-sum
    # happen in-kernel, so no extra whole-array HBM passes over the R*N^2 array.
    # TODO(synk): int8 adjacency is exact only for unweighted (0/1) edges; keep a
    # wider dtype for weighted graphs.
    a_i8 = a if a.dtype == jnp.int8 else a.astype(jnp.int8)
    a_p = jnp.pad(a_i8, ((0, 0), (0, np_ - n), (0, np_ - n)))
    x_p = jnp.pad(x.astype(jnp.bfloat16), ((0, np_ - n), (0, d_pad - d_in)))

    w = jnp.pad(params["w2"], ((0, 0), (0, d_pad - d_in), (0, o_pad - d_out)))
    w_cat = jnp.transpose(w, (1, 0, 2)).reshape(d_pad, num_rel * o_pad)
    w_cat = w_cat.astype(jnp.bfloat16)                                 # [Dp, R*Op]
    b1 = jnp.pad(params["bias1"], (0, d_pad - d_in)
                 ).reshape(1, d_pad).astype(jnp.float32)
    b2 = jnp.pad(params["bias2"], (0, o_pad - d_out)
                 ).reshape(1, o_pad).astype(jnp.float32)

    cparams = pltpu.CompilerParams(
        # dst tiles shard across TensorCores (v7x megacore); src axis is the
        # accumulation sweep and must stay "arbitrary".
        dimension_semantics=("parallel", "arbitrary"),
        vmem_limit_bytes=32 * 1024 * 1024)

    # ---- kernel 1: HW[s, r*Op:(r+1)*Op] = relu(layer1(X))[s] @ W_r
    hw = pl.pallas_call(
        functools.partial(_layer1_kernel, num_rel=num_rel),
        out_shape=jax.ShapeDtypeStruct((np_, num_rel * o_pad), jnp.bfloat16),
        grid_spec=pltpu.PrefetchScalarGridSpec(
            num_scalar_prefetch=0,
            grid=grid,
            in_specs=[
                pl.BlockSpec((num_rel, td, ts), lambda d, s: (0, d, s)),      # A
                pl.BlockSpec((ts, d_pad), lambda d, s: (s, 0)),               # X
                pl.BlockSpec((d_pad, num_rel * o_pad), lambda d, s: (0, 0)),  # W_cat
                pl.BlockSpec((1, d_pad), lambda d, s: (0, 0)),                # bias1
            ],
            out_specs=pl.BlockSpec((td, num_rel * o_pad), lambda d, s: (d, 0)),
            scratch_shapes=[
                pltpu.VMEM((num_rel, td, d_pad), jnp.float32),   # per-rel agg acc
                pltpu.VMEM((num_rel, td, 1), jnp.float32),       # per-rel degree
            ],
        ),
        compiler_params=cparams,
    )(a_p, x_p, w_cat, b1)

    # ---- kernel 2: out = sum_r (A_r @ HW_r) / clamp(deg_r,1) + b2
    out = pl.pallas_call(
        functools.partial(_layer2_kernel, num_rel=num_rel, o_pad=o_pad),
        out_shape=jax.ShapeDtypeStruct((np_, o_pad), jnp.float32),
        grid_spec=pltpu.PrefetchScalarGridSpec(
            num_scalar_prefetch=0,
            grid=grid,
            in_specs=[
                pl.BlockSpec((num_rel, td, ts), lambda d, s: (0, d, s)),      # A
                pl.BlockSpec((ts, num_rel * o_pad), lambda d, s: (s, 0)),     # HW
                pl.BlockSpec((1, o_pad), lambda d, s: (0, 0)),                # bias2
            ],
            out_specs=pl.BlockSpec((td, o_pad), lambda d, s: (d, 0)),
            scratch_shapes=[
                pltpu.VMEM((num_rel, td, o_pad), jnp.float32),
                pltpu.VMEM((num_rel, td, 1), jnp.float32),
            ],
        ),
        compiler_params=cparams,
    )(a_p, hw, b2)

    return {"customer": out[:n, :d_out]}


if __name__ == "__main__":
    # small shapes: N nodes of single ntype 'customer', R=2 relations
    N, H_DIM, OUT_DIM, R = 16, 32, 8, 2

    key = jax.random.PRNGKey(0)
    k_adj, k_x, k_w = jax.random.split(key, 3)

    # synthetic heterograph adjacency (dense per relation, int8 0/1) and features
    adjacency = jax.random.bernoulli(k_adj, 0.3, (R, N, N)).astype(jnp.int8)
    x = jax.random.normal(k_x, (N, H_DIM), dtype=jnp.float32)  # g.ndata['x']['customer']

    # deterministic parameter init (mirrors nn.init in the module):
    #   h_bias -> zeros ; layer-2 weight -> xavier_uniform(gain=relu gain)
    gain = float(np.sqrt(2.0))
    fan_in, fan_out = H_DIM * OUT_DIM, R * OUT_DIM   # PyTorch fan rules, 3-D tensor
    bound = gain * float(np.sqrt(6.0 / (fan_in + fan_out)))
    w2 = jax.random.uniform(k_w, (R, H_DIM, OUT_DIM), jnp.float32, -bound, bound)
    params = {
        "bias1": jnp.zeros((H_DIM,), jnp.float32),
        "bias2": jnp.zeros((OUT_DIM,), jnp.float32),
        "w2": w2,
    }

    out = entity_classify_forward(adjacency, x, params)
    out = jax.block_until_ready(out)

    # plain-JAX f32 reference (kernel uses bf16 MXU inputs + f32 accumulation,
    # so compare at a bf16-appropriate tolerance)
    adj_f32 = adjacency.astype(jnp.float32)
    deg = jnp.clip(jnp.sum(adj_f32, axis=2, keepdims=True), 1.0, None)
    an = adj_f32 / deg
    h1_ref = jax.nn.relu(jnp.einsum("rds,sf->df", an, x) + params["bias1"])
    h2_ref = jnp.einsum("rds,sf,rfo->do", an, h1_ref, w2) + params["bias2"]
    np.testing.assert_allclose(np.asarray(out["customer"]), np.asarray(h2_ref),
                               rtol=2e-2, atol=2e-2)

    # TODO(synk): DGL sampling-based `inference()` (DataLoader / blocks minibatch
    # path) has no dense-kernel equivalent and is not reproduced; full-graph
    # forward only.
    print("KERNEL_OK")
</pallas_src>

<mosaic_0001>
module attributes {stable_mosaic.version = 11 : i64} {
  func.func @_layer1_kernel(%arg0: i32, %arg1: i32, %arg2: memref<2x128x128xi8, #tpu.memory_space<vmem>>, %arg3: memref<128x128xbf16, #tpu.memory_space<vmem>>, %arg4: memref<128x256xbf16, #tpu.memory_space<vmem>>, %arg5: memref<1x128xf32, #tpu.memory_space<vmem>>, %arg6: memref<128x256xbf16, #tpu.memory_space<vmem>>, %arg7: memref<2x128x128xf32, #tpu.memory_space<vmem>>, %arg8: memref<2x128x1xf32, #tpu.memory_space<vmem>>) attributes {dimension_semantics = [#tpu.dimension_semantics<parallel>, #tpu.dimension_semantics<arbitrary>], iteration_bounds = array<i64: 1, 1>, scalar_prefetch = 0 : i64, scratch_operands = 2 : i64, tpu.core_type = #tpu.core_type<tc>, window_params = [{transform_indices = @transform_0, window_bounds = array<i64: 2, 128, 128>}, {transform_indices = @transform_1, window_bounds = array<i64: 128, 128>}, {pipeline_mode = #tpu.pipeline_mode<synchronous>, transform_indices = @transform_2, window_bounds = array<i64: 128, 256>}, {pipeline_mode = #tpu.pipeline_mode<synchronous>, transform_indices = @transform_3, window_bounds = array<i64: 1, 128>}, {transform_indices = @transform_4, window_bounds = array<i64: 128, 256>}]} {
    %c0_i32 = arith.constant 0 : i32
    %0 = arith.cmpi eq, %arg1, %c0_i32 : i32
    %1 = arith.extui %0 : i1 to i32
    %c0_i32_0 = arith.constant 0 : i32
    %2 = arith.cmpi ne, %1, %c0_i32_0 : i32
    scf.if %2 {
      %cst_36 = arith.constant 0.000000e+00 : f32
      %45 = vector.broadcast %cst_36 : f32 to vector<2x128x128xf32>
      %c0_37 = arith.constant 0 : index
      %c0_38 = arith.constant 0 : index
      %c0_39 = arith.constant 0 : index
      %46 = vector.load %arg7[%c0_37, %c0_38, %c0_39] : memref<2x128x128xf32, #tpu.memory_space<vmem>>, vector<2x128x128xf32>
      tpu.vector_store %arg7[%c0_37, %c0_38, %c0_39], %45 {strides = array<i32>} : memref<2x128x128xf32, #tpu.memory_space<vmem>>, vector<2x128x128xf32>,
      %cst_40 = arith.constant 0.000000e+00 : f32
      %47 = vector.broadcast %cst_40 : f32 to vector<2x128x1xf32>
      %c0_41 = arith.constant 0 : index
      %c0_42 = arith.constant 0 : index
      %c0_43 = arith.constant 0 : index
      %48 = vector.load %arg8[%c0_41, %c0_42, %c0_43] : memref<2x128x1xf32, #tpu.memory_space<vmem>>, vector<2x128x1xf32>
      tpu.vector_store %arg8[%c0_41, %c0_42, %c0_43], %47 {strides = array<i32>} : memref<2x128x1xf32, #tpu.memory_space<vmem>>, vector<2x128x1xf32>,
    } else {
    }
    %c0 = arith.constant 0 : index
    %c0_1 = arith.constant 0 : index
    %3 = vector.load %arg3[%c0, %c0_1] : memref<128x128xbf16, #tpu.memory_space<vmem>>, vector<128x128xbf16>
    %c0_2 = arith.constant 0 : index
    %c0_3 = arith.constant 0 : index
    %c0_4 = arith.constant 0 : index
    %4 = vector.load %arg2[%c0_2, %c0_3, %c0_4] : memref<2x128x128xi8, #tpu.memory_space<vmem>>, vector<1x128x128xi8>
    %5 = vector.shape_cast %4 : vector<1x128x128xi8> to vector<128x128xi8>
    %6 = arith.sitofp %5 : vector<128x128xi8> to vector<128x128xf32>
    %c0_5 = arith.constant 0 : index
    %c0_6 = arith.constant 0 : index
    %c0_7 = arith.constant 0 : index
    %7 = vector.load %arg8[%c0_5, %c0_6, %c0_7] : memref<2x128x1xf32, #tpu.memory_space<vmem>>, vector<1x128x1xf32>
    %8 = vector.shape_cast %7 : vector<1x128x1xf32> to vector<128x1xf32>
    %cst = arith.constant dense<0.000000e+00> : vector<128xf32>
    %9 = vector.multi_reduction <add>, %6, %cst [1] : vector<128x128xf32> to vector<128xf32>
    %10 = vector.shape_cast %9 : vector<128xf32> to vector<128x1xf32>
    %11 = arith.addf %8, %10 : vector<128x1xf32>
    %c0_8 = arith.constant 0 : index
    %c0_9 = arith.constant 0 : index
    %c0_10 = arith.constant 0 : index
    %12 = vector.load %arg8[%c0_8, %c0_9, %c0_10] : memref<2x128x1xf32, #tpu.memory_space<vmem>>, vector<1x128x1xf32>
    %13 = vector.shape_cast %12 : vector<1x128x1xf32> to vector<128x1xf32>
    %14 = vector.shape_cast %11 : vector<128x1xf32> to vector<1x128x1xf32>
    tpu.vector_store %arg8[%c0_8, %c0_9, %c0_10], %14 {strides = array<i32>} : memref<2x128x1xf32, #tpu.memory_space<vmem>>, vector<1x128x1xf32>,
    %c0_11 = arith.constant 0 : index
    %c0_12 = arith.constant 0 : index
    %c0_13 = arith.constant 0 : index
    %15 = vector.load %arg7[%c0_11, %c0_12, %c0_13] : memref<2x128x128xf32, #tpu.memory_space<vmem>>, vector<1x128x128xf32>
    %16 = vector.shape_cast %15 : vector<1x128x128xf32> to vector<128x128xf32>
    %17 = arith.truncf %6 : vector<128x128xf32> to vector<128x128xbf16>
    %cst_14 = arith.constant dense<0.000000e+00> : vector<128x128xf32>
    %18 = tpu.matmul %17, %3, %cst_14 {dimension_numbers = #tpu.dot_dimension_numbers<[1], [0], [0], [1], [0, 0, 1, 1], [], []>} : vector<128x128xbf16>, vector<128x128xbf16>, vector<128x128xf32> -> vector<128x128xf32>
    %19 = arith.addf %16, %18 : vector<128x128xf32>
    %c0_15 = arith.constant 0 : index
    %c0_16 = arith.constant 0 : index
    %c0_17 = arith.constant 0 : index
    %20 = vector.load %arg7[%c0_15, %c0_16, %c0_17] : memref<2x128x128xf32, #tpu.memory_space<vmem>>, vector<1x128x128xf32>
    %21 = vector.shape_cast %20 : vector<1x128x128xf32> to vector<128x128xf32>
    %22 = vector.shape_cast %19 : vector<128x128xf32> to vector<1x128x128xf32>
    tpu.vector_store %arg7[%c0_15, %c0_16, %c0_17], %22 {strides = array<i32>} : memref<2x128x128xf32, #tpu.memory_space<vmem>>, vector<1x128x128xf32>,
    %c1 = arith.constant 1 : index
    %c0_18 = arith.constant 0 : index
    %c0_19 = arith.constant 0 : index
    %23 = vector.load %arg2[%c1, %c0_18, %c0_19] : memref<2x128x128xi8, #tpu.memory_space<vmem>>, vector<1x128x128xi8>
    %24 = vector.shape_cast %23 : vector<1x128x128xi8> to vector<128x128xi8>
    %25 = arith.sitofp %24 : vector<128x128xi8> to vector<128x128xf32>
    %c1_20 = arith.constant 1 : index
    %c0_21 = arith.constant 0 : index
    %c0_22 = arith.constant 0 : index
    %26 = vector.load %arg8[%c1_20, %c0_21, %c0_22] : memref<2x128x1xf32, #tpu.memory_space<vmem>>, vector<1x128x1xf32>
    %27 = vector.shape_cast %26 : vector<1x128x1xf32> to vector<128x1xf32>
    %cst_23 = arith.constant dense<0.000000e+00> : vector<128xf32>
    %28 = vector.multi_reduction <add>, %25, %cst_23 [1] : vector<128x128xf32> to vector<128xf32>
    %29 = vector.shape_cast %28 : vector<128xf32> to vector<128x1xf32>
    %30 = arith.addf %27, %29 : vector<128x1xf32>
    %c1_24 = arith.constant 1 : index
    %c0_25 = arith.constant 0 : index
    %c0_26 = arith.constant 0 : index
    %31 = vector.load %arg8[%c1_24, %c0_25, %c0_26] : memref<2x128x1xf32, #tpu.memory_space<vmem>>, vector<1x128x1xf32>
    %32 = vector.shape_cast %31 : vector<1x128x1xf32> to vector<128x1xf32>
    %33 = vector.shape_cast %30 : vector<128x1xf32> to vector<1x128x1xf32>
    tpu.vector_store %arg8[%c1_24, %c0_25, %c0_26], %33 {strides = array<i32>} : memref<2x128x1xf32, #tpu.memory_space<vmem>>, vector<1x128x1xf32>,
    %c1_27 = arith.constant 1 : index
    %c0_28 = arith.constant 0 : index
    %c0_29 = arith.constant 0 : index
    %34 = vector.load %arg7[%c1_27, %c0_28, %c0_29] : memref<2x128x128xf32, #tpu.memory_space<vmem>>, vector<1x128x128xf32>
    %35 = vector.shape_cast %34 : vector<1x128x128xf32> to vector<128x128xf32>
    %36 = arith.truncf %25 : vector<128x128xf32> to vector<128x128xbf16>
    %cst_30 = arith.constant dense<0.000000e+00> : vector<128x128xf32>
    %37 = tpu.matmul %36, %3, %cst_30 {dimension_numbers = #tpu.dot_dimension_numbers<[1], [0], [0], [1], [0, 0, 1, 1], [], []>} : vector<128x128xbf16>, vector<128x128xbf16>, vector<128x128xf32> -> vector<128x128xf32>
    %38 = arith.addf %35, %37 : vector<128x128xf32>
    %c1_31 = arith.constant 1 : index
    %c0_32 = arith.constant 0 : index
    %c0_33 = arith.constant 0 : index
    %39 = vector.load %arg7[%c1_31, %c0_32, %c0_33] : memref<2x128x128xf32, #tpu.memory_space<vmem>>, vector<1x128x128xf32>
    %40 = vector.shape_cast %39 : vector<1x128x128xf32> to vector<128x128xf32>
    %41 = vector.shape_cast %38 : vector<128x128xf32> to vector<1x128x128xf32>
    tpu.vector_store %arg7[%c1_31, %c0_32, %c0_33], %41 {strides = array<i32>} : memref<2x128x128xf32, #tpu.memory_space<vmem>>, vector<1x128x128xf32>,
    %c0_i32_34 = arith.constant 0 : i32
    %42 = arith.cmpi eq, %arg1, %c0_i32_34 : i32
    %43 = arith.extui %42 : i1 to i32
    %c0_i32_35 = arith.constant 0 : i32
    %44 = arith.cmpi ne, %43, %c0_i32_35 : i32
    scf.if %44 {
      %cst_36 = arith.constant 0.000000e+00 : f32
      %45 = vector.broadcast %cst_36 : f32 to vector<128x128xf32>
      %c0_37 = arith.constant 0 : index
      %c0_38 = arith.constant 0 : index
      %c0_39 = arith.constant 0 : index
      %46 = vector.load %arg8[%c0_37, %c0_38, %c0_39] : memref<2x128x1xf32, #tpu.memory_space<vmem>>, vector<1x128x1xf32>
      %47 = vector.shape_cast %46 : vector<1x128x1xf32> to vector<128x1xf32>
      %cst_40 = arith.constant 1.000000e+00 : f32
      %48 = vector.broadcast %cst_40 : f32 to vector<128x1xf32>
      %49 = arith.maximumf %47, %48 : vector<128x1xf32>
      %cst_41 = arith.constant 1.000000e+00 : f32
      %50 = vector.broadcast %cst_41 : f32 to vector<128x1xf32>
      %51 = arith.divf %50, %49 : vector<128x1xf32>
      %c0_42 = arith.constant 0 : index
      %c0_43 = arith.constant 0 : index
      %c0_44 = arith.constant 0 : index
      %52 = vector.load %arg7[%c0_42, %c0_43, %c0_44] : memref<2x128x128xf32, #tpu.memory_space<vmem>>, vector<1x128x128xf32>
      %53 = vector.shape_cast %52 : vector<1x128x128xf32> to vector<128x128xf32>
      %54 = vector.broadcast %51 : vector<128x1xf32> to vector<128x128xf32>
      %55 = arith.mulf %53, %54 : vector<128x128xf32>
      %56 = arith.addf %45, %55 : vector<128x128xf32>
      %c1_45 = arith.constant 1 : index
      %c0_46 = arith.constant 0 : index
      %c0_47 = arith.constant 0 : index
      %57 = vector.load %arg8[%c1_45, %c0_46, %c0_47] : memref<2x128x1xf32, #tpu.memory_space<vmem>>, vector<1x128x1xf32>
      %58 = vector.shape_cast %57 : vector<1x128x1xf32> to vector<128x1xf32>
      %cst_48 = arith.constant 1.000000e+00 : f32
      %59 = vector.broadcast %cst_48 : f32 to vector<128x1xf32>
      %60 = arith.maximumf %58, %59 : vector<128x1xf32>
      %cst_49 = arith.constant 1.000000e+00 : f32
      %61 = vector.broadcast %cst_49 : f32 to vector<128x1xf32>
      %62 = arith.divf %61, %60 : vector<128x1xf32>
      %c1_50 = arith.constant 1 : index
      %c0_51 = arith.constant 0 : index
      %c0_52 = arith.constant 0 : index
      %63 = vector.load %arg7[%c1_50, %c0_51, %c0_52] : memref<2x128x128xf32, #tpu.memory_space<vmem>>, vector<1x128x128xf32>
      %64 = vector.shape_cast %63 : vector<1x128x128xf32> to vector<128x128xf32>
      %65 = vector.broadcast %62 : vector<128x1xf32> to vector<128x128xf32>
      %66 = arith.mulf %64, %65 : vector<128x128xf32>
      %67 = arith.addf %56, %66 : vector<128x128xf32>
      %c0_53 = arith.constant 0 : index
      %c0_54 = arith.constant 0 : index
      %68 = vector.load %arg5[%c0_53, %c0_54] : memref<1x128xf32, #tpu.memory_space<vmem>>, vector<1x128xf32>
      %69 = vector.broadcast %68 : vector<1x128xf32> to vector<128x128xf32>
      %70 = arith.addf %67, %69 : vector<128x128xf32>
      %cst_55 = arith.constant 0.000000e+00 : f32
      %71 = vector.broadcast %cst_55 : f32 to vector<128x128xf32>
      %72 = arith.maximumf %70, %71 : vector<128x128xf32>
      %73 = arith.truncf %72 : vector<128x128xf32> to vector<128x128xbf16>
      %c0_56 = arith.constant 0 : index
      %c0_57 = arith.constant 0 : index
      %74 = vector.load %arg4[%c0_56, %c0_57] : memref<128x256xbf16, #tpu.memory_space<vmem>>, vector<128x256xbf16>
      %cst_58 = arith.constant dense<0.000000e+00> : vector<128x256xf32>
      %75 = tpu.matmul %73, %74, %cst_58 {dimension_numbers = #tpu.dot_dimension_numbers<[1], [0], [0], [1], [0, 0, 1, 1], [], []>} : vector<128x128xbf16>, vector<128x256xbf16>, vector<128x256xf32> -> vector<128x256xf32>
      %76 = arith.truncf %75 : vector<128x256xf32> to vector<128x256xbf16>
      %c0_59 = arith.constant 0 : index
      %c0_60 = arith.constant 0 : index
      %77 = vector.load %arg6[%c0_59, %c0_60] : memref<128x256xbf16, #tpu.memory_space<vmem>>, vector<128x256xbf16>
      tpu.vector_store %arg6[%c0_59, %c0_60], %76 {strides = array<i32>} : memref<128x256xbf16, #tpu.memory_space<vmem>>, vector<128x256xbf16>,
    } else {
    }
    return
  }
  func.func @transform_0(%arg0: i32, %arg1: i32) -> (i32, i32, i32) {
    %c0_i32 = arith.constant 0 : i32
    %c0_i32_0 = arith.constant 0 : i32
    return %c0_i32, %arg0, %arg1 : i32, i32, i32
  }
  func.func @transform_1(%arg0: i32, %arg1: i32) -> (i32, i32) {
    %c0_i32 = arith.constant 0 : i32
    %c0_i32_0 = arith.constant 0 : i32
    return %arg1, %c0_i32 : i32, i32
  }
  func.func @transform_2(%arg0: i32, %arg1: i32) -> (i32, i32) {
    %c0_i32 = arith.constant 0 : i32
    %c0_i32_0 = arith.constant 0 : i32
    %c0_i32_1 = arith.constant 0 : i32
    return %c0_i32, %c0_i32_0 : i32, i32
  }
  func.func @transform_3(%arg0: i32, %arg1: i32) -> (i32, i32) {
    %c0_i32 = arith.constant 0 : i32
    %c0_i32_0 = arith.constant 0 : i32
    %c0_i32_1 = arith.constant 0 : i32
    return %c0_i32, %c0_i32_0 : i32, i32
  }
  func.func @transform_4(%arg0: i32, %arg1: i32) -> (i32, i32) {
    %c0_i32 = arith.constant 0 : i32
    %c0_i32_0 = arith.constant 0 : i32
    return %arg0, %c0_i32 : i32, i32
  }
}

</mosaic_0001>

<bundles_post_ra>
// kernel: tpu_custom_call.1
= control target key start
LH: loop header
LB: loop body
LE: loop exit
PB: predicated region body
PF: predicated region fallthrough
CT: control target
= control target key end

     0   :  { %9 = vsyncpa [#allocation5], 0  ;;  %s2200_s0 = inlined_call_operand.hbm [shape: s8[2,128,128], index: 0, kind: input, shape index: {}]   ;;  %s2201_s1 = inlined_call_operand.hbm [shape: bf16[128,128], index: 1, kind: input, shape index: {}]   ;;  %s2202_s2 = inlined_call_operand.hbm [shape: bf16[128,256], index: 2, kind: input, shape index: {}]   ;;  %s2203_s3 = inlined_call_operand.vmem [shape: f32[1,128], index: 3, kind: input, shape index: {}]   ;;  %s2204_s4 = inlined_call_operand.hbm [shape: bf16[128,256], index: 4, kind: output, shape index: {}]  }
   0x1   :  { %10 = vsyncpa [#allocation8], 0 }
   0x2   :  { %11 = vsyncpa [#allocation6], 0  ;;  %s1863_s15 = smov [#allocation7]   ;;  %s1769_s19 = scalar_lea.hbm %s2201_s1, 1024 }
   0x3   :  { %s29_s16 = sshll.u32 %s1863_s15, 4  ;;  %p1770_p0 = scmp.ne.s32.totalorder %s2201_s1, %s1769_s19  ;;  %s30_s16 = int_to_ptr.vmem [resolvable:$true] %s29_s16 }
   0x4   :  { %p1773_p1 = scmp.lt.u32.totalorder %s1769_s19, %s2201_s1 }
   0x6   :  { %p1775_p2 = pnand %p1773_p1, %p1770_p0 }
   0x8   :  { %1778 = shalt.err (!%p1775_p2)
}
   0x9   :  { %s1779_s24 = scalar_lea.vmem %s30_s16, 1024  ;;  %p1784_p4 = scmp.lt.s32.totalorder %s30_s16, %s30_s16 }
   0xa   :  { %p1780_p3 = scmp.ne.s32.totalorder %s30_s16, %s1779_s24  ;;  %p1785_p5 = scmp.lt.s32.totalorder %s1779_s24, %s1779_s24 }
   0xc   :  { %p1786_p6 = por %p1785_p5, %p1784_p4 }
   0xe   :  { %p1787_p7 = pnand %p1786_p6, %p1780_p3 }
  0x10   :  { %1790 = shalt.err (!%p1787_p7)
}
  0x11   :  { %s1864_s25 = smov 64   ;;  %s1865_s26 = smov 4  }
  0x12   :  { %35 = dma.hbm_to_vmem [thread:$0]  %s2201_s1, 1024, %s30_s16, [#allocation8], %s1864_s25, %s1864_s25, %s1865_s26  }
  0x13   :  { %s1866_s29 = smov [#allocation4]   ;;  %s1791_s7 = scalar_lea.hbm %s2200_s0, 1024 }
  0x14   :  { %s17_s30 = sshll.u32 %s1866_s29, 4  ;;  %p1792_p8 = scmp.ne.s32.totalorder %s2200_s0, %s1791_s7  ;;  %s18_s30 = int_to_ptr.vmem [resolvable:$true] %s17_s30 }
  0x15   :  { %p1795_p9 = scmp.lt.u32.totalorder %s1791_s7, %s2200_s0 }
  0x17   :  { %p1797_p10 = pnand %p1795_p9, %p1792_p8 }
  0x19   :  { %1800 = shalt.err (!%p1797_p10)
}
  0x1a   :  { %s1801_s12 = scalar_lea.vmem %s18_s30, 1024  ;;  %p1806_p12 = scmp.lt.s32.totalorder %s18_s30, %s18_s30 }
  0x1b   :  { %p1802_p11 = scmp.ne.s32.totalorder %s18_s30, %s1801_s12  ;;  %p1807_p13 = scmp.lt.s32.totalorder %s1801_s12, %s1801_s12 }
  0x1d   :  { %p1808_p0 = por %p1807_p13, %p1806_p12 }
  0x1f   :  { %p1809_p1 = pnand %p1808_p0, %p1802_p11 }
  0x21   :  { %1812 = shalt.err (!%p1809_p1)
}
  0x22   :  { %s1867_s1 = smov 128   ;;  %s1868_s13 = smov 8  }
  0x23   :  { %23 = dma.hbm_to_vmem [thread:$0]  %s2200_s0, 1024, %s18_s30, [#allocation5], %s1867_s1, %s1867_s1, %s1868_s13  }
  0x24   :  { %s1869_s16 = smov [#allocation9]   ;;  %s1813_s20 = scalar_lea.hbm %s2202_s2, 2048 }
  0x25   :  { %s41_s17 = sshll.u32 %s1869_s16, 4  ;;  %p1814_p2 = scmp.ne.s32.totalorder %s2202_s2, %s1813_s20  ;;  %s42_s17 = int_to_ptr.vmem [resolvable:$true] %s41_s17 }
  0x26   :  { %p1817_p3 = scmp.lt.u32.totalorder %s1813_s20, %s2202_s2 }
  0x28   :  { %p1819_p4 = pnand %p1817_p3, %p1814_p2 }
  0x2a   :  { %1822 = shalt.err (!%p1819_p4)
}
  0x2b   :  { %s1823_s25 = scalar_lea.vmem %s42_s17, 2048  ;;  %p1828_p6 = scmp.lt.s32.totalorder %s42_s17, %s42_s17 }
  0x2c   :  { %p1824_p5 = scmp.ne.s32.totalorder %s42_s17, %s1823_s25  ;;  %p1829_p7 = scmp.lt.s32.totalorder %s1823_s25, %s1823_s25 }
  0x2e   :  { %p1830_p8 = por %p1829_p7, %p1828_p6 }
  0x30   :  { %p1831_p9 = pnand %p1830_p8, %p1824_p5 }
  0x32   :  { %1834 = shalt.err (!%p1831_p9)
}
  0x33   :  { %47 = dma.hbm_to_vmem [thread:$0]  %s2202_s2, 2048, %s42_s17, [#allocation8], %s1867_s1, %s1867_s1, %s1868_s13  }
  0x34   :  { %1857 = dma.done.wait [#allocation5], 1024  }
  0x35   :  { %1858 = vsyncadd [#allocation5], 4294966272 }
  0x36   :  { %1859 = dma.done.wait [#allocation8], 3072  }
  0x37   :  { %1860 = vsyncadd [#allocation8], 4294964224  ;;  %vm96_vm0 = vcmask 7168   ;;  %v1870_v0 = vmov 0.0   ;;  %v1972_v1 = vld [vmem:[#allocation4 + $0x20] sm:$0xff]  ;;  %v1982_v10 = vld [vmem:[#allocation7 + $0x8] sm:$0xff]  }
  0x38   :  { %113 = vst.msk [vmem:[#allocation3 + $0x80] sm:$0xff] %vm96_vm0, %v1870_v0  ;;  %97 = vst.msk [vmem:[#allocation3] sm:$0xff] %vm96_vm0, %v1870_v0  ;;  %v1974_v2 = vld [vmem:[#allocation4] sm:$0xff]  ;;  %v468_v3 = vunpack.c.0.s8 %v1972_v1  ;;  %v469_v5 = vunpack.c.1.s8 %v1972_v1  ;;  %v1989_v15 = vld [vmem:[#allocation7 + $0x10] sm:$0xff]   ;;  %v471_v17 = vunpack.c.3.s8 %v1972_v1  ;;  %v470_v20 = vunpack.c.2.s8 %v1972_v1 }
  0x39   :  { %98 = vst.msk [vmem:[#allocation3 + $0x8] sm:$0xff] %vm96_vm0, %v1870_v0  ;;  %99 = vst.msk [vmem:[#allocation3 + $0x10] sm:$0xff] %vm96_vm0, %v1870_v0  ;;  %v149_v4 = vunpack.c.0.s8 %v1974_v2  ;;  %v150_v6 = vunpack.c.1.s8 %v1974_v2  ;;  %v1980_v7 = vld [vmem:[#allocation7] sm:$0xff]   ;;  %v152_v13 = vunpack.c.3.s8 %v1974_v2  ;;  %v151_v14 = vunpack.c.2.s8 %v1974_v2  ;;  %v1992_v18 = vld [vmem:[#allocation4 + $0x8] sm:$0xff] }
  0x3a   :  { %100 = vst.msk [vmem:[#allocation3 + $0x18] sm:$0xff] %vm96_vm0, %v1870_v0  ;;  %101 = vst.msk [vmem:[#allocation3 + $0x20] sm:$0xff] %vm96_vm0, %v1870_v0  ;;  %v484_v8 = vcvt.s32.f32 %v468_v3  ;;  %1597 = vmatprep.subr.bf16.mxu1 %v1980_v7  ;;  %v485_v11 = vcvt.s32.f32 %v469_v5  ;;  %v1996_v21 = vld [vmem:[#allocation7 + $0x18] sm:$0xff]   ;;  %v154_v22 = vunpack.c.1.s8 %v1992_v18  ;;  %v2000_v23 = vld [vmem:[#allocation4 + $0x28] sm:$0xff]  ;;  %v487_v24 = vcvt.s32.f32 %v471_v17 }
  0x3b   :  { %102 = vst.msk [vmem:[#allocation3 + $0x28] sm:$0xff] %vm96_vm0, %v1870_v0  ;;  %103 = vst.msk [vmem:[#allocation3 + $0x30] sm:$0xff] %vm96_vm0, %v1870_v0  ;;  %v165_v9 = vcvt.s32.f32 %v149_v4  ;;  %v166_v12 = vcvt.s32.f32 %v150_v6  ;;  %1598 = vmatpush3.bf16.msra.mxu1 %v1980_v7  ;;  %v168_v16 = vcvt.s32.f32 %v152_v13  ;;  %v167_v19 = vcvt.s32.f32 %v151_v14  ;;  %v2003_v27 = vld [vmem:[#allocation7 + $0x20] sm:$0xff]   ;;  %v2012_v33 = vld [vmem:[#allocation7 + $0x28] sm:$0xff]  }
  0x3c   :  { %104 = vst.msk [vmem:[#allocation3 + $0x38] sm:$0xff] %vm96_vm0, %v1870_v0  ;;  %105 = vst.msk [vmem:[#allocation3 + $0x40] sm:$0xff] %vm96_vm0, %v1870_v0  ;;  %517 = vadd.xlane.f32.xlu1 %v484_v8  ;;  %1599 = vmatprep.subr.bf16.mxu1 %v1982_v10  ;;  %v486_v25 = vcvt.s32.f32 %v470_v20  ;;  %v153_v26 = vunpack.c.0.s8 %v1992_v18  ;;  %v278_v28 = vunpack.c.l.s8.bf16 %v1974_v2  ;;  %v170_v29 = vcvt.s32.f32 %v154_v22  ;;  %v2018_v38 = vld [vmem:[#allocation7 + $0x30] sm:$0xff]   ;;  %v2026_v44 = vld [vmem:[#allocation7 + $0x38] sm:$0xff]  }
  0x3d   :  { %106 = vst.msk [vmem:[#allocation3 + $0x48] sm:$0xff] %vm96_vm0, %v1870_v0  ;;  %107 = vst.msk [vmem:[#allocation3 + $0x50] sm:$0xff] %vm96_vm0, %v1870_v0  ;;  %197 = vadd.xlane.f32.xlu0 %v165_v9  ;;  %v473_v30 = vunpack.c.1.s8 %v2000_v23  ;;  %v472_v32 = vunpack.c.0.s8 %v2000_v23  ;;  %v156_v35 = vunpack.c.3.s8 %v1992_v18  ;;  %v155_v37 = vunpack.c.2.s8 %v1992_v18  ;;  %v2022_v43 = vld [vmem:[#allocation4 + $0x10] sm:$0xff]  ;;  %v467_v9 = vld [vmem:[#allocation4 + $0x38] sm:$0xff] }
  0x3e   :  { %108 = vst.msk [vmem:[#allocation3 + $0x58] sm:$0xff] %vm96_vm0, %v1870_v0  ;;  %109 = vst.msk [vmem:[#allocation3 + $0x60] sm:$0xff] %vm96_vm0, %v1870_v0  ;;  %1613 = vmatprep.mubr.bf16.mxu1 %v278_v28  ;;  %v169_v31 = vcvt.s32.f32 %v153_v26  ;;  %v475_v40 = vunpack.c.3.s8 %v2000_v23  ;;  %v474_v42 = vunpack.c.2.s8 %v2000_v23  ;;  %v158_v46 = vunpack.c.1.s8 %v2022_v43  ;;  %v2030_v49 = vld [vmem:[#allocation4 + $0x30] sm:$0xff] }
  0x3f   :  { %110 = vst.msk [vmem:[#allocation3 + $0x68] sm:$0xff] %vm96_vm0, %v1870_v0  ;;  %111 = vst.msk [vmem:[#allocation3 + $0x70] sm:$0xff] %vm96_vm0, %v1870_v0  ;;  %1600 = vmatpush3.bf16.msra.mxu1 %v1982_v10  ;;  %v489_v34 = vcvt.s32.f32 %v473_v30  ;;  %v488_v36 = vcvt.s32.f32 %v472_v32  ;;  %v172_v39 = vcvt.s32.f32 %v156_v35  ;;  %v171_v41 = vcvt.s32.f32 %v155_v37  ;;  %v1684_v37 = vld [vmem:[#allocation9 + $0x14] ss:$8 sps:$4 sm:$0xff]  }
  0x40   :  { %112 = vst.msk [vmem:[#allocation3 + $0x78] sm:$0xff] %vm96_vm0, %v1870_v0  ;;  %114 = vst.msk [vmem:[#allocation3 + $0x88] sm:$0xff] %vm96_vm0, %v1870_v0  ;;  %519 = vadd.xlane.f32.xlu1 %v485_v11  ;;  %1601 = vmatprep.subr.bf16.mxu1 %v1989_v15  ;;  %v491_v45 = vcvt.s32.f32 %v475_v40  ;;  %v490_v47 = vcvt.s32.f32 %v474_v42  ;;  %v157_v48 = vunpack.c.0.s8 %v2022_v43  ;;  %v174_v50 = vcvt.s32.f32 %v158_v46  ;;  %v501_v40 = vld [vmem:[#allocation3 + $0x80] sm:$0xff] }
  0x41   :  { %115 = vst.msk [vmem:[#allocation3 + $0x90] sm:$0xff] %vm96_vm0, %v1870_v0  ;;  %116 = vst.msk [vmem:[#allocation3 + $0x98] sm:$0xff] %vm96_vm0, %v1870_v0  ;;  %199 = vadd.xlane.f32.xlu0 %v166_v12  ;;  %v477_v51 = vunpack.c.1.s8 %v2030_v49  ;;  %v476_v53 = vunpack.c.0.s8 %v2030_v49  ;;  %v279_v54 = vunpack.c.h.s8.bf16 %v1974_v2  ;;  %v280_v55 = vunpack.c.l.s8.bf16 %v1992_v18 }
  0x42   :  { %117 = vst.msk [vmem:[#allocation3 + $0xa0] sm:$0xff] %vm96_vm0, %v1870_v0  ;;  %118 = vst.msk [vmem:[#allocation3 + $0xa8] sm:$0xff] %vm96_vm0, %v1870_v0  ;;  %v173_v52 = vcvt.s32.f32 %v157_v48  ;;  %v160_v57 = vunpack.c.3.s8 %v2022_v43  ;;  %v159_v59 = vunpack.c.2.s8 %v2022_v43  ;;  %v479_v61 = vunpack.c.3.s8 %v2030_v49 }
  0x43   :  { %119 = vst.msk [vmem:[#allocation3 + $0xb0] sm:$0xff] %vm96_vm0, %v1870_v0  ;;  %120 = vst.msk [vmem:[#allocation3 + $0xb8] sm:$0xff] %vm96_vm0, %v1870_v0  ;;  %1602 = vmatpush3.bf16.msra.mxu1 %v1989_v15  ;;  %v493_v56 = vcvt.s32.f32 %v477_v51  ;;  %v492_v58 = vcvt.s32.f32 %v476_v53  ;;  %v478_v63 = vunpack.c.2.s8 %v2030_v49  ;;  %v281_v2 = vunpack.c.h.s8.bf16 %v1992_v18  ;;  %v183_v53 = vld [vmem:[#allocation3 + $0x10] sm:$0xff] }
  0x44   :  { %121 = vst.msk [vmem:[#allocation3 + $0xc0] sm:$0xff] %vm96_vm0, %v1870_v0  ;;  %122 = vst.msk [vmem:[#allocation3 + $0xc8] sm:$0xff] %vm96_vm0, %v1870_v0  ;;  %203 = vadd.xlane.f32.xlu1 %v168_v16  ;;  %1603 = vmatprep.subr.bf16.mxu1 %v1996_v21  ;;  %v176_v60 = vcvt.s32.f32 %v160_v57  ;;  %v175_v62 = vcvt.s32.f32 %v159_v59  ;;  %v1871_v3 = vmov 0   ;;  %v282_v4 = vunpack.c.l.s8.bf16 %v2022_v43 }
  0x45   :  { %123 = vst.msk [vmem:[#allocation3 + $0xd0] sm:$0xff] %vm96_vm0, %v1870_v0  ;;  %124 = vst.msk [vmem:[#allocation3 + $0xd8] sm:$0xff] %vm96_vm0, %v1870_v0  ;;  %201 = vadd.xlane.f32.xlu0 %v167_v19  ;;  %1672 = vset.pattern.permute.xlu1 %v1871_v3  ;;  %v495_v5 = vcvt.s32.f32 %v479_v61  ;;  %v481_v11 = vunpack.c.1.s8 %v467_v9  ;;  %v480_v13 = vunpack.c.0.s8 %v467_v9  ;;  %v283_v14 = vunpack.c.h.s8.bf16 %v2022_v43 }
  0x46   :  { %125 = vst.msk [vmem:[#allocation3 + $0xe0] sm:$0xff] %vm96_vm0, %v1870_v0  ;;  %126 = vst.msk [vmem:[#allocation3 + $0xe8] sm:$0xff] %vm96_vm0, %v1870_v0  ;;  %1671 = vset.pattern.permute.xlu0 %v1871_v3  ;;  %1297 = vmatprep.mubr.bf16.mxu0 %v1871_v3  ;;  %v483_v22 = vunpack.c.3.s8 %v467_v9  ;;  %v598_v26 = vunpack.c.l.s8.bf16 %v1972_v1  ;;  %v600_v30 = vunpack.c.l.s8.bf16 %v2000_v23  ;;  %v602_v32 = vunpack.c.l.s8.bf16 %v2030_v49 }
  0x47   :  { %127 = vst.msk [vmem:[#allocation3 + $0xf0] sm:$0xff] %vm96_vm0, %v1870_v0  ;;  %128 = vst.msk [vmem:[#allocation3 + $0xf8] sm:$0xff] %vm96_vm0, %v1870_v0  ;;  %1604 = vmatpush3.bf16.msra.mxu1 %v1996_v21  ;;  %v148_v0 = vld [vmem:[#allocation4 + $0x18] sm:$0xff]  ;;  %v497_v17 = vcvt.s32.f32 %v481_v11  ;;  %v605_v35 = vunpack.c.h.s8.bf16 %v467_v9  ;;  %v502_v46 = vld [vmem:[#allocation3 + $0x88] sm:$0xff] }
  0x48   :  { %523 = vadd.xlane.f32.xlu1 %v487_v24  ;;  %1605 = vmatprep.subr.bf16.mxu1 %v2003_v27  ;;  %v162_v6 = vunpack.c.1.s8 %v148_v0  ;;  %v161_v8 = vunpack.c.0.s8 %v148_v0  ;;  %v284_v16 = vunpack.c.l.s8.bf16 %v148_v0  ;;  %v164_v18 = vunpack.c.3.s8 %v148_v0  ;;  %v503_v59 = vld [vmem:[#allocation3 + $0x90] sm:$0xff] }
  0x49   :  { %521 = vadd.xlane.f32.xlu0 %v486_v25  ;;  %v163_v19 = vunpack.c.2.s8 %v148_v0  ;;  %v482_v24 = vunpack.c.2.s8 %v467_v9  ;;  %v285_v25 = vunpack.c.h.s8.bf16 %v148_v0  ;;  %v499_v28 = vcvt.s32.f32 %v483_v22 }
  0x4a   :  { %v177_v12 = vcvt.s32.f32 %v161_v8  ;;  %v180_v20 = vcvt.s32.f32 %v164_v18 }
  0x4b   :  { %1606 = vmatpush3.bf16.msra.mxu1 %v2003_v27 }
  0x4c   :  { %207 = vadd.xlane.f32.xlu1 %v170_v29  ;;  %1607 = vmatprep.subr.bf16.mxu1 %v2012_v33  ;;  %v599_v29 = vunpack.c.h.s8.bf16 %v1972_v1  ;;  %v1681_v1 = vld [vmem:[#allocation9 + $0x4] ss:$8 sps:$4 sm:$0xff]  }
  0x4d   :  { %205 = vadd.xlane.f32.xlu0 %v169_v31  ;;  %v601_v31 = vunpack.c.h.s8.bf16 %v2000_v23  ;;  %1265 = vmatprep.subr.bf16.mxu0 %v1681_v1  ;;  %v1687_v23 = vld [vmem:[#allocation9 + $0x24] ss:$8 sps:$4 sm:$0xff]  }
  0x4f   :  { %1608 = vmatpush3.bf16.msra.mxu1 %v2012_v33 }
  0x50   :  { %527 = vadd.xlane.f32.xlu1 %v489_v34  ;;  %1609 = vmatprep.subr.bf16.mxu1 %v2018_v38  ;;  %v604_v34 = vunpack.c.l.s8.bf16 %v467_v9 }
  0x51   :  { %525 = vadd.xlane.f32.xlu0 %v488_v36  ;;  %v1683_v36 = vld [vmem:[#allocation9] ss:$8 sps:$4 sm:$0xff]  }
  0x52   :  { %1266 = vmatpush1.bf16.msra.mxu0 %v1683_v36  ;;  %v507_v36 = vld [vmem:[#allocation3 + $0xb0] sm:$0xff] }
  0x53   :  { %1610 = vmatpush3.bf16.msra.mxu1 %v2018_v38  ;;  %1267 = vmatprep.subr.bf16.mxu0 %v1684_v37 }
  0x54   :  { %211 = vadd.xlane.f32.xlu1 %v172_v39  ;;  %1611 = vmatprep.subr.bf16.mxu1 %v2026_v44  ;;  %v1689_v39 = vld [vmem:[#allocation9 + $0x20] ss:$8 sps:$4 sm:$0xff]  }
  0x55   :  { %209 = vadd.xlane.f32.xlu0 %v171_v41  ;;  %v181_v41 = vld [vmem:[#allocation3] sm:$0xff] }
  0x57   :  { %1612 = vmatpush3.bf16.msra.mxu1 %v2026_v44 }
  0x58   :  { %531 = vadd.xlane.f32.xlu1 %v491_v45  ;;  %1629 = vmatprep.subr.bf16.mxu1 %v1980_v7 }
  0x59   :  { %529 = vadd.xlane.f32.xlu0 %v490_v47  ;;  %v182_v47 = vld [vmem:[#allocation3 + $0x8] sm:$0xff] }
  0x5a   :  { %1614 = vmatmul.mubr.bf16.vlgmr.msra.gmra.mrb[0].mxu1 %v279_v54 }
  0x5b   :  { %1630 = vmatpush3.bf16.msra.mxu1 %v1980_v7  ;;  %1617 = vmatprep.mubr.bf16.mxu1 %v280_v55  ;;  %v494_v7 = vcvt.s32.f32 %v478_v63 }
  0x5c   :  { %215 = vadd.xlane.f32.xlu1 %v174_v50  ;;  %1631 = vmatprep.subr.bf16.mxu1 %v1982_v10 }
  0x5d   :  { %213 = vadd.xlane.f32.xlu0 %v173_v52  ;;  %v184_v52 = vld [vmem:[#allocation3 + $0x18] sm:$0xff] }
  0x5f   :  { %1632 = vmatpush3.bf16.msra.mxu1 %v1982_v10  ;;  %v178_v10 = vcvt.s32.f32 %v162_v6 }
  0x60   :  { %535 = vadd.xlane.f32.xlu1 %v493_v56  ;;  %1633 = vmatprep.subr.bf16.mxu1 %v1989_v15 }
  0x61   :  { %533 = vadd.xlane.f32.xlu0 %v492_v58  ;;  %v504_v58 = vld [vmem:[#allocation3 + $0x98] sm:$0xff] }
  0x62   :  { %1618 = vmatmul.mubr.bf16.gmra.mrb[4].mxu1 %v281_v2 }
  0x63   :  { %1634 = vmatpush3.bf16.msra.mxu1 %v1989_v15  ;;  %1621 = vmatprep.mubr.bf16.mxu1 %v282_v4  ;;  %v496_v15 = vcvt.s32.f32 %v480_v13 }
  0x64   :  { %219 = vadd.xlane.f32.xlu1 %v176_v60  ;;  %1635 = vmatprep.subr.bf16.mxu1 %v1996_v21 }
  0x65   :  { %217 = vadd.xlane.f32.xlu0 %v175_v62 }
  0x67   :  { %1636 = vmatpush3.bf16.msra.mxu1 %v1996_v21  ;;  %v179_v21 = vcvt.s32.f32 %v163_v19 }
  0x68   :  { %539 = vadd.xlane.f32.xlu1 %v495_v5  ;;  %1637 = vmatprep.subr.bf16.mxu1 %v2003_v27  ;;  %v186_v5 = vld [vmem:[#allocation3 + $0x28] sm:$0xff] }
  0x69   :  { %537 = vadd.xlane.f32.xlu0 %v494_v7  ;;  %v185_v7 = vld [vmem:[#allocation3 + $0x20] sm:$0xff] }
  0x6a   :  { %1622 = vmatmul.mubr.bf16.gmra.mrb[8].mxu1 %v283_v14 }
  0x6b   :  { %1638 = vmatpush3.bf16.msra.mxu1 %v2003_v27  ;;  %1625 = vmatprep.mubr.bf16.mxu1 %v284_v16  ;;  %v498_v27 = vcvt.s32.f32 %v482_v24  ;;  %v506_v16 = vld [vmem:[#allocation3 + $0xa8] sm:$0xff]  ;;  %v188_v24 = vld [vmem:[#allocation3 + $0x38] sm:$0xff] }
  0x6c   :  { %223 = vadd.xlane.f32.xlu1 %v178_v10  ;;  %1639 = vmatprep.subr.bf16.mxu1 %v2012_v33 }
  0x6d   :  { %221 = vadd.xlane.f32.xlu0 %v177_v12 }
  0x6f   :  { %1640 = vmatpush3.bf16.msra.mxu1 %v2012_v33  ;;  %v603_v33 = vunpack.c.h.s8.bf16 %v2030_v49 }
  0x70   :  { %543 = vadd.xlane.f32.xlu1 %v497_v17  ;;  %1641 = vmatprep.subr.bf16.mxu1 %v2018_v38  ;;  %v505_v17 = vld [vmem:[#allocation3 + $0xa0] sm:$0xff] }
  0x71   :  { %541 = vadd.xlane.f32.xlu0 %v496_v15 }
  0x72   :  { %1626 = vmatmul.mubr.bf16.gmra.mrb[12].mxu1 %v285_v25  ;;  %v187_v25 = vld [vmem:[#allocation3 + $0x30] sm:$0xff] }
  0x73   :  { %1642 = vmatpush3.bf16.msra.mxu1 %v2018_v38  ;;  %1645 = vmatprep.mubr.bf16.mxu1 %v598_v26  ;;  %v1686_v38 = vld [vmem:[#allocation9 + $0x10] ss:$8 sps:$4 sm:$0xff]  }
  0x74   :  { %227 = vadd.xlane.f32.xlu1 %v180_v20  ;;  %1643 = vmatprep.subr.bf16.mxu1 %v2026_v44 }
  0x75   :  { %225 = vadd.xlane.f32.xlu0 %v179_v21  ;;  %1268 = vmatpush1.bf16.msra.mxu0 %v1686_v38 }
  0x76   :  { %1269 = vmatprep.subr.bf16.mxu0 %v1687_v23 }
  0x77   :  { %1644 = vmatpush3.bf16.msra.mxu1 %v2026_v44 }
  0x78   :  { %547 = vadd.xlane.f32.xlu1 %v499_v28 }
  0x79   :  { %545 = vadd.xlane.f32.xlu0 %v498_v27  ;;  %1270 = vmatpush1.bf16.msra.mxu0 %v1689_v39 }
  0x7a   :  { %1646 = vmatmul.mubr.bf16.vlgmr.msra.gmra.mrb[16].mxu1 %v599_v29 }
  0x7b   :  { %1649 = vmatprep.mubr.bf16.mxu1 %v600_v30 }
  0x82   :  { %1650 = vmatmul.mubr.bf16.gmra.mrb[20].mxu1 %v601_v31  ;;  %v1690_v31 = vld [vmem:[#allocation9 + $0x34] ss:$8 sps:$4 sm:$0xff]  }
  0x83   :  { %1653 = vmatprep.mubr.bf16.mxu1 %v602_v32  ;;  %v1692_v32 = vld [vmem:[#allocation9 + $0x30] ss:$8 sps:$4 sm:$0xff]   ;;  %1271 = vmatprep.subr.bf16.mxu0 %v1690_v31 }
  0x84   :  { %1272 = vmatpush1.bf16.msra.mxu0 %v1692_v32 }
  0x8a   :  { %1654 = vmatmul.mubr.bf16.gmra.mrb[24].mxu1 %v603_v33 }
  0x8b   :  { %1657 = vmatprep.mubr.bf16.mxu1 %v604_v34 }
  0x92   :  { %1658 = vmatmul.mubr.bf16.gmra.mrb[28].mxu1 %v605_v35  ;;  %v508_v35 = vld [vmem:[#allocation3 + $0xb8] sm:$0xff] }
  0xc9   :  { %v518_v42 = vpop.xlane.xlu1 %517 }
  0xca   :  { %v198_v43 = vpop.xlane.xlu0 %197  ;;  %v549_v44 = vadd.f32 %v518_v42, %v501_v40  ;;  %v1693_v42 = vld [vmem:[#allocation9 + $0x44] ss:$8 sps:$4 sm:$0xff]  }
  0xcb   :  { %v229_v45 = vadd.f32 %v198_v43, %v181_v41  ;;  %v1695_v43 = vld [vmem:[#allocation9 + $0x40] ss:$8 sps:$4 sm:$0xff]   ;;  %1273 = vmatprep.subr.bf16.mxu0 %v1693_v42 }
  0xcc   :  { %565 = vst.msk [vmem:[#allocation3 + $0x80] sm:$0xff] %vm96_vm0, %v549_v44  ;;  %1274 = vmatpush1.bf16.msra.mxu0 %v1695_v43 }
  0xcd   :  { %246 = vst.msk [vmem:[#allocation3] sm:$0xff] %vm96_vm0, %v229_v45  ;;  %v520_v48 = vpop.xlane.xlu1 %519 }
  0xce   :  { %v200_v49 = vpop.xlane.xlu0 %199  ;;  %v550_v50 = vadd.f32 %v520_v48, %v502_v46 }
  0xcf   :  { %v230_v51 = vadd.f32 %v200_v49, %v182_v47  ;;  %v190_v47 = vld [vmem:[#allocation3 + $0x48] sm:$0xff]  ;;  %v189_v49 = vld [vmem:[#allocation3 + $0x40] sm:$0xff] }
  0xd0   :  { %566 = vst.msk [vmem:[#allocation3 + $0x88] sm:$0xff] %vm96_vm0, %v550_v50 }
  0xd1   :  { %247 = vst.msk [vmem:[#allocation3 + $0x8] sm:$0xff] %vm96_vm0, %v230_v51  ;;  %v204_v54 = vpop.xlane.xlu1 %203 }
  0xd2   :  { %v202_v55 = vpop.xlane.xlu0 %201  ;;  %v232_v56 = vadd.f32 %v204_v54, %v184_v52 }
  0xd3   :  { %v231_v57 = vadd.f32 %v202_v55, %v183_v53  ;;  %v930_v0 = vld [vmem:[#allocation3 + $0x80] sm:$0xff]  ;;  %v1696_v55 = vld [vmem:[#allocation9 + $0x54] ss:$8 sps:$4 sm:$0xff]  }
  0xd4   :  { %v738_v60 = vld [vmem:[#allocation3] sm:$0xff]  ;;  %249 = vst.msk [vmem:[#allocation3 + $0x18] sm:$0xff] %vm96_vm0, %v232_v56  ;;  %v946_v9 = vmax.f32 %v930_v0, 1.0  ;;  %1275 = vmatprep.subr.bf16.mxu0 %v1696_v55 }
  0xd5   :  { %248 = vst.msk [vmem:[#allocation3 + $0x10] sm:$0xff] %vm96_vm0, %v231_v57  ;;  %v754_v61 = vmax.f32 %v738_v60, 1.0  ;;  %v524_v62 = vpop.xlane.xlu1 %523  ;;  %v510_v60 = vld [vmem:[#allocation3 + $0xc8] sm:$0xff] }
  0xd6   :  { %v522_v63 = vpop.xlane.xlu0 %521  ;;  %v552_v2 = vadd.f32 %v524_v62, %v504_v58  ;;  %v509_v62 = vld [vmem:[#allocation3 + $0xc0] sm:$0xff] }
  0xd7   :  { %v551_v4 = vadd.f32 %v522_v63, %v503_v59  ;;  %1705 = vrcp.f32 %v754_v61  ;;  %v931_v12 = vld [vmem:[#allocation3 + $0x88] sm:$0xff]  ;;  %v1698_v59 = vld [vmem:[#allocation9 + $0x50] ss:$8 sps:$4 sm:$0xff]  }
  0xd8   :  { %v739_v6 = vld [vmem:[#allocation3 + $0x8] sm:$0xff]  ;;  %568 = vst.msk [vmem:[#allocation3 + $0x98] sm:$0xff] %vm96_vm0, %v552_v2  ;;  %v947_v18 = vmax.f32 %v931_v12, 1.0  ;;  %1276 = vmatpush1.bf16.msra.mxu0 %v1698_v59 }
  0xd9   :  { %567 = vst.msk [vmem:[#allocation3 + $0x90] sm:$0xff] %vm96_vm0, %v551_v4  ;;  %v755_v8 = vmax.f32 %v739_v6, 1.0  ;;  %v208_v10 = vpop.xlane.xlu1 %207  ;;  %v1699_v6 = vld [vmem:[#allocation9 + $0x64] ss:$8 sps:$4 sm:$0xff]  }
  0xda   :  { %v206_v11 = vpop.xlane.xlu0 %205  ;;  %v234_v13 = vadd.f32 %v208_v10, %v186_v5  ;;  %v1701_v10 = vld [vmem:[#allocation9 + $0x60] ss:$8 sps:$4 sm:$0xff]   ;;  %1277 = vmatprep.subr.bf16.mxu0 %v1699_v6 }
  0xdb   :  { %1707 = vrcp.f32 %v755_v8  ;;  %v233_v14 = vadd.f32 %v206_v11, %v185_v7  ;;  %v741_v30 = vld [vmem:[#allocation3 + $0x18] sm:$0xff] }
  0xdc   :  { %251 = vst.msk [vmem:[#allocation3 + $0x28] sm:$0xff] %vm96_vm0, %v234_v13  ;;  %1709 = vrcp.f32 %v946_v9  ;;  %v740_v20 = vld [vmem:[#allocation3 + $0x10] sm:$0xff]  ;;  %v757_v23 = vmax.f32 %v741_v30, 1.0  ;;  %v192_v11 = vld [vmem:[#allocation3 + $0x58] sm:$0xff]  ;;  %1278 = vmatpush1.bf16.msra.mxu0 %v1701_v10 }
  0xdd   :  { %250 = vst.msk [vmem:[#allocation3 + $0x20] sm:$0xff] %vm96_vm0, %v233_v14  ;;  %v528_v15 = vpop.xlane.xlu1 %527  ;;  %1711 = vrcp.f32 %v947_v18  ;;  %v756_v28 = vmax.f32 %v740_v20, 1.0  ;;  %v191_v13 = vld [vmem:[#allocation3 + $0x50] sm:$0xff]  ;;  %v516_v10 = vld [vmem:[#allocation3 + $0xf8] sm:$0xff] }
  0xde   :  { %v526_v19 = vpop.xlane.xlu0 %525  ;;  %v554_v22 = vadd.f32 %v528_v15, %v506_v16  ;;  %v1702_v20 = vld [vmem:[#allocation9 + $0x74] ss:$8 sps:$4 sm:$0xff]  }
  0xdf   :  { %v553_v21 = vadd.f32 %v526_v19, %v505_v17  ;;  %1713 = vrcp.f32 %v756_v28  ;;  %v933_v54 = vld [vmem:[#allocation3 + $0x98] sm:$0xff]  ;;  %1279 = vmatprep.subr.bf16.mxu0 %v1702_v20 }
  0xe0   :  { %570 = vst.msk [vmem:[#allocation3 + $0xa8] sm:$0xff] %vm96_vm0, %v554_v22  ;;  %v932_v41 = vld [vmem:[#allocation3 + $0x90] sm:$0xff]  ;;  %v949_v0 = vmax.f32 %v933_v54, 1.0 }
  0xe1   :  { %v1706_v26 = vpop.eup %1705  ;;  %569 = vst.msk [vmem:[#allocation3 + $0xa0] sm:$0xff] %vm96_vm0, %v553_v21  ;;  %v212_v27 = vpop.xlane.xlu1 %211  ;;  %v948_v51 = vmax.f32 %v932_v41, 1.0 }
  0xe2   :  { %820 = vperm.xlu0 %1671, %v1706_v26   ;;  %v210_v29 = vpop.xlane.xlu0 %209  ;;  %v236_v33 = vadd.f32 %v212_v27, %v188_v24  ;;  %v512_v26 = vld [vmem:[#allocation3 + $0xd8] sm:$0xff]  ;;  %v511_v27 = vld [vmem:[#allocation3 + $0xd0] sm:$0xff] }
  0xe3   :  { %v235_v34 = vadd.f32 %v210_v29, %v187_v25  ;;  %v743_v1 = vld [vmem:[#allocation3 + $0x28] sm:$0xff]  ;;  %v1704_v25 = vld [vmem:[#allocation9 + $0x70] ss:$8 sps:$4 sm:$0xff]  }
  0xe4   :  { %253 = vst.msk [vmem:[#allocation3 + $0x38] sm:$0xff] %vm96_vm0, %v236_v33  ;;  %v759_v38 = vmax.f32 %v743_v1, 1.0  ;;  %v742_v5 = vld [vmem:[#allocation3 + $0x20] sm:$0xff]  ;;  %1280 = vmatpush1.bf16.msra.mxu0 %v1704_v25 }
  0xe5   :  { %v1708_v37 = vpop.eup %1707  ;;  %252 = vst.msk [vmem:[#allocation3 + $0x30] sm:$0xff] %vm96_vm0, %v235_v34  ;;  %v532_v39 = vpop.xlane.xlu1 %531  ;;  %v758_v17 = vmax.f32 %v742_v5, 1.0 }
  0xe6   :  { %825 = vperm.xlu1 %1672, %v1708_v37   ;;  %v530_v40 = vpop.xlane.xlu0 %529  ;;  %v1710_v44 = vpop.eup %1709  ;;  %v556_v45 = vadd.f32 %v532_v39, %v508_v35  ;;  %1715 = vrcp.f32 %v759_v38  ;;  %v194_v37 = vld [vmem:[#allocation3 + $0x68] sm:$0xff] }
  0xe7   :  { %v555_v46 = vadd.f32 %v530_v40, %v507_v36  ;;  %v935_v48 = vld [vmem:[#allocation3 + $0xa8] sm:$0xff]  ;;  %1717 = vrcp.f32 %v757_v23  ;;  %v1712_v56 = vpop.eup %1711  ;;  %v193_v23 = vld [vmem:[#allocation3 + $0x60] sm:$0xff] }
  0xe8   :  { %572 = vst.msk [vmem:[#allocation3 + $0xb8] sm:$0xff] %vm96_vm0, %v556_v45  ;;  %v951_v50 = vmax.f32 %v935_v48, 1.0  ;;  %v934_v19 = vld [vmem:[#allocation3 + $0xa0] sm:$0xff]  ;;  %v514_v48 = vld [vmem:[#allocation3 + $0xe8] sm:$0xff] }
  0xe9   :  { %571 = vst.msk [vmem:[#allocation3 + $0xb0] sm:$0xff] %vm96_vm0, %v555_v46  ;;  %v216_v52 = vpop.xlane.xlu1 %215  ;;  %v1714_v7 = vpop.eup %1713  ;;  %v950_v31 = vmax.f32 %v934_v19, 1.0 }
  0xea   :  { %1012 = vperm.xlu1 %1672, %v1710_v44   ;;  %v214_v53 = vpop.xlane.xlu0 %213  ;;  %v238_v57 = vadd.f32 %v216_v52, %v190_v47  ;;  %1719 = vrcp.f32 %v951_v50  ;;  %v513_v50 = vld [vmem:[#allocation3 + $0xe0] sm:$0xff] }
  0xeb   :  { %v237_v58 = vadd.f32 %v214_v53, %v189_v49  ;;  %v745_v61 = vld [vmem:[#allocation3 + $0x38] sm:$0xff]  ;;  %1721 = vrcp.f32 %v948_v51 }
  0xec   :  { %255 = vst.msk [vmem:[#allocation3 + $0x48] sm:$0xff] %vm96_vm0, %v238_v57  ;;  %v761_v63 = vmax.f32 %v745_v61, 1.0  ;;  %v744_v34 = vld [vmem:[#allocation3 + $0x30] sm:$0xff] }
  0xed   :  { %254 = vst.msk [vmem:[#allocation3 + $0x40] sm:$0xff] %vm96_vm0, %v237_v58  ;;  %v536_v2 = vpop.xlane.xlu1 %535  ;;  %v760_v41 = vmax.f32 %v744_v34, 1.0 }
  0xee   :  { %1017 = vperm.xlu1 %1672, %v1712_v56   ;;  %v534_v4 = vpop.xlane.xlu0 %533  ;;  %v558_v8 = vadd.f32 %v536_v2, %v510_v60  ;;  %1723 = vrcp.f32 %v761_v63  ;;  %v196_v60 = vld [vmem:[#allocation3 + $0x78] sm:$0xff] }
  0xef   :  { %v557_v9 = vadd.f32 %v534_v4, %v509_v62  ;;  %v937_v12 = vld [vmem:[#allocation3 + $0xb8] sm:$0xff]  ;;  %1725 = vrcp.f32 %v949_v0  ;;  %v195_v62 = vld [vmem:[#allocation3 + $0x70] sm:$0xff] }
  0xf0   :  { %v1716_v14 = vpop.eup %1715  ;;  %574 = vst.msk [vmem:[#allocation3 + $0xc8] sm:$0xff] %vm96_vm0, %v558_v8  ;;  %v953_v16 = vmax.f32 %v937_v12, 1.0  ;;  %v936_v44 = vld [vmem:[#allocation3 + $0xb0] sm:$0xff] }
  0xf1   :  { %573 = vst.msk [vmem:[#allocation3 + $0xc0] sm:$0xff] %vm96_vm0, %v557_v9  ;;  %v220_v18 = vpop.xlane.xlu1 %219  ;;  %845 = vperm.xlu0 %1671, %v1716_v14   ;;  %v1718_v22 = vpop.eup %1717  ;;  %v952_v53 = vmax.f32 %v936_v44, 1.0  ;;  %v515_v12 = vld [vmem:[#allocation3 + $0xf0] sm:$0xff] }
  0xf2   :  { %830 = vperm.xlu1 %1672, %v1714_v7   ;;  %v218_v15 = vpop.xlane.xlu0 %217  ;;  %v240_v21 = vadd.f32 %v220_v18, %v192_v11  ;;  %1727 = vrcp.f32 %v953_v16 }
  0xf3   :  { %v239_v24 = vadd.f32 %v218_v15, %v191_v13  ;;  %v747_v28 = vld [vmem:[#allocation3 + $0x48] sm:$0xff]  ;;  %1729 = vrcp.f32 %v758_v17 }
  0xf4   :  { %v1720_v29 = vpop.eup %1719  ;;  %257 = vst.msk [vmem:[#allocation3 + $0x58] sm:$0xff] %vm96_vm0, %v240_v21  ;;  %v763_v30 = vmax.f32 %v747_v28, 1.0  ;;  %v746_v56 = vld [vmem:[#allocation3 + $0x40] sm:$0xff] }
  0xf5   :  { %256 = vst.msk [vmem:[#allocation3 + $0x50] sm:$0xff] %vm96_vm0, %v239_v24  ;;  %v540_v32 = vpop.xlane.xlu1 %539  ;;  %1037 = vperm.xlu0 %1671, %v1720_v29   ;;  %v1722_v35 = vpop.eup %1721  ;;  %v762_v2 = vmax.f32 %v746_v56, 1.0 }
  0xf6   :  { %835 = vperm.xlu1 %1672, %v1718_v22   ;;  %v538_v33 = vpop.xlane.xlu0 %537  ;;  %v560_v1 = vadd.f32 %v540_v32, %v512_v26  ;;  %1731 = vrcp.f32 %v763_v30 }
  0xf7   :  { %v559_v36 = vadd.f32 %v538_v33, %v511_v27  ;;  %v939_v38 = vld [vmem:[#allocation3 + $0xc8] sm:$0xff]  ;;  %1733 = vrcp.f32 %v950_v31 }
  0xf8   :  { %v1724_v39 = vpop.eup %1723  ;;  %576 = vst.msk [vmem:[#allocation3 + $0xd8] sm:$0xff] %vm96_vm0, %v560_v1  ;;  %v955_v40 = vmax.f32 %v939_v38, 1.0  ;;  %v938_v6 = vld [vmem:[#allocation3 + $0xc0] sm:$0xff] }
  0xf9   :  { %575 = vst.msk [vmem:[#allocation3 + $0xd0] sm:$0xff] %vm96_vm0, %v559_v36  ;;  %v224_v42 = vpop.xlane.xlu1 %223  ;;  %855 = vperm.xlu0 %1671, %v1724_v39   ;;  %v1726_v45 = vpop.eup %1725  ;;  %v954_v16 = vmax.f32 %v938_v6, 1.0 }
  0xfa   :  { %1022 = vperm.xlu1 %1672, %v1722_v35   ;;  %v222_v43 = vpop.xlane.xlu0 %221  ;;  %v242_v46 = vadd.f32 %v224_v42, %v194_v37  ;;  %1735 = vrcp.f32 %v955_v40 }
  0xfb   :  { %v241_v47 = vadd.f32 %v222_v43, %v193_v23  ;;  %v749_v49 = vld [vmem:[#allocation3 + $0x58] sm:$0xff]  ;;  %1737 = vrcp.f32 %v760_v41 }
  0xfc   :  { %v1728_v51 = vpop.eup %1727  ;;  %259 = vst.msk [vmem:[#allocation3 + $0x68] sm:$0xff] %vm96_vm0, %v242_v46  ;;  %v765_v52 = vmax.f32 %v749_v49, 1.0  ;;  %v748_v15 = vld [vmem:[#allocation3 + $0x50] sm:$0xff] }
  0xfd   :  { %258 = vst.msk [vmem:[#allocation3 + $0x60] sm:$0xff] %vm96_vm0, %v241_v47  ;;  %v544_v54 = vpop.xlane.xlu1 %543  ;;  %1047 = vperm.xlu0 %1671, %v1728_v51   ;;  %v1730_v57 = vpop.eup %1729  ;;  %v764_v26 = vmax.f32 %v748_v15, 1.0 }
  0xfe   :  { %1027 = vperm.xlu1 %1672, %v1726_v45   ;;  %v542_v55 = vpop.xlane.xlu0 %541  ;;  %v562_v58 = vadd.f32 %v544_v54, %v514_v48  ;;  %1739 = vrcp.f32 %v765_v52 }
  0xff   :  { %v561_v59 = vadd.f32 %v542_v55, %v513_v50  ;;  %v941_v61 = vld [vmem:[#allocation3 + $0xd8] sm:$0xff]  ;;  %1741 = vrcp.f32 %v952_v53 }
 0x100   :  { %v1732_v63 = vpop.eup %1731  ;;  %578 = vst.msk [vmem:[#allocation3 + $0xe8] sm:$0xff] %vm96_vm0, %v562_v58  ;;  %v957_v0 = vmax.f32 %v941_v61, 1.0  ;;  %v940_v28 = vld [vmem:[#allocation3 + $0xd0] sm:$0xff] }
 0x101   :  { %577 = vst.msk [vmem:[#allocation3 + $0xe0] sm:$0xff] %vm96_vm0, %v561_v59  ;;  %v228_v4 = vpop.xlane.xlu1 %227  ;;  %865 = vperm.xlu0 %1671, %v1732_v63   ;;  %v1734_v7 = vpop.eup %1733  ;;  %v956_v32 = vmax.f32 %v940_v28, 1.0 }
 0x102   :  { %840 = vperm.xlu1 %1672, %v1730_v57   ;;  %v226_v5 = vpop.xlane.xlu0 %225  ;;  %v244_v8 = vadd.f32 %v228_v4, %v196_v60  ;;  %1743 = vrcp.f32 %v957_v0 }
 0x103   :  { %v243_v9 = vadd.f32 %v226_v5, %v195_v62  ;;  %v751_v11 = vld [vmem:[#allocation3 + $0x68] sm:$0xff]  ;;  %1745 = vrcp.f32 %v762_v2 }
 0x104   :  { %v1736_v13 = vpop.eup %1735  ;;  %261 = vst.msk [vmem:[#allocation3 + $0x78] sm:$0xff] %vm96_vm0, %v244_v8  ;;  %v767_v14 = vmax.f32 %v751_v11, 1.0  ;;  %v750_v33 = vld [vmem:[#allocation3 + $0x60] sm:$0xff] }
 0x105   :  { %260 = vst.msk [vmem:[#allocation3 + $0x70] sm:$0xff] %vm96_vm0, %v243_v9  ;;  %v548_v17 = vpop.xlane.xlu1 %547  ;;  %1057 = vperm.xlu0 %1671, %v1736_v13   ;;  %v1738_v19 = vpop.eup %1737  ;;  %v766_v37 = vmax.f32 %v750_v33, 1.0 }
 0x106   :  { %1032 = vperm.xlu1 %1672, %v1734_v7   ;;  %v546_v18 = vpop.xlane.xlu0 %545  ;;  %v564_v20 = vadd.f32 %v548_v17, %v516_v10  ;;  %1747 = vrcp.f32 %v767_v14 }
 0x107   :  { %v563_v22 = vadd.f32 %v546_v18, %v515_v12  ;;  %v943_v21 = vld [vmem:[#allocation3 + $0xe8] sm:$0xff]  ;;  %1749 = vrcp.f32 %v954_v16 }
 0x108   :  { %v1740_v24 = vpop.eup %1739  ;;  %580 = vst.msk [vmem:[#allocation3 + $0xf8] sm:$0xff] %vm96_vm0, %v564_v20  ;;  %v959_v25 = vmax.f32 %v943_v21, 1.0  ;;  %v942_v38 = vld [vmem:[#allocation3 + $0xe0] sm:$0xff] }
 0x109   :  { %579 = vst.msk [vmem:[#allocation3 + $0xf0] sm:$0xff] %vm96_vm0, %v563_v22  ;;  %875 = vperm.xlu0 %1671, %v1740_v24   ;;  %v1742_v27 = vpop.eup %1741  ;;  %v958_v40 = vmax.f32 %v942_v38, 1.0 }
 0x10a   :  { %850 = vperm.xlu1 %1672, %v1738_v19   ;;  %1751 = vrcp.f32 %v959_v25 }
 0x10b   :  { %v753_v29 = vld [vmem:[#allocation3 + $0x78] sm:$0xff]  ;;  %1753 = vrcp.f32 %v764_v26 }
 0x10c   :  { %v1744_v30 = vpop.eup %1743  ;;  %v769_v31 = vmax.f32 %v753_v29, 1.0  ;;  %v752_v41 = vld [vmem:[#allocation3 + $0x70] sm:$0xff] }
 0x10d   :  { %1067 = vperm.xlu0 %1671, %v1744_v30   ;;  %v1746_v34 = vpop.eup %1745  ;;  %v768_v44 = vmax.f32 %v752_v41, 1.0  ;;  %v2142_v30 = vld [vmem:[%s2203_s3] ss:$0 sm:$0xff]  ;;  %s1872_s3 = smov [#allocation10]  }
 0x10e   :  { %1042 = vperm.xlu1 %1672, %v1742_v27   ;;  %1755 = vrcp.f32 %v769_v31  ;;  %s1495_s28 = sshll.u32 %s1872_s3, 4  ;;  %s1496_s28 = int_to_ptr.vmem [resolvable:$true] %s1495_s28 }
 0x10f   :  { %v945_v35 = vld [vmem:[#allocation3 + $0xf8] sm:$0xff]  ;;  %1757 = vrcp.f32 %v956_v32  ;;  %s1835_s29 = scalar_lea.vmem %s1496_s28, 2048  ;;  %p1840_p11 = scmp.lt.s32.totalorder %s1496_s28, %s1496_s28 }
 0x110   :  { %v1748_v1 = vpop.eup %1747  ;;  %v961_v36 = vmax.f32 %v945_v35, 1.0  ;;  %v944_v45 = vld [vmem:[#allocation3 + $0xf0] sm:$0xff]  ;;  %p1836_p10 = scmp.ne.s32.totalorder %s1496_s28, %s1835_s29  ;;  %p1841_p12 = scmp.lt.s32.totalorder %s1835_s29, %s1835_s29 }
 0x111   :  { %885 = vperm.xlu0 %1671, %v1748_v1   ;;  %v1750_v23 = vpop.eup %1749  ;;  %v960_v48 = vmax.f32 %v944_v45, 1.0 }
 0x112   :  { %860 = vperm.xlu1 %1672, %v1746_v34   ;;  %1759 = vrcp.f32 %v961_v36  ;;  %p1842_p13 = por %p1841_p12, %p1840_p11 }
 0x113   :  { %1761 = vrcp.f32 %v766_v37 }
 0x114   :  { %v1752_v39 = vpop.eup %1751  ;;  %1763 = vrcp.f32 %v958_v40  ;;  %p1843_p0 = pnand %p1842_p13, %p1836_p10 }
 0x115   :  { %1077 = vperm.xlu0 %1671, %v1752_v39   ;;  %v1754_v42 = vpop.eup %1753  ;;  %1765 = vrcp.f32 %v768_v44 }
 0x116   :  { %1052 = vperm.xlu1 %1672, %v1750_v23   ;;  %1767 = vrcp.f32 %v960_v48 }
 0x118   :  { %v1756_v43 = vpop.eup %1755 }
 0x119   :  { %895 = vperm.xlu0 %1671, %v1756_v43   ;;  %v1758_v46 = vpop.eup %1757 }
 0x11a   :  { %870 = vperm.xlu1 %1672, %v1754_v42  }
 0x11c   :  { %v1760_v47 = vpop.eup %1759 }
 0x11d   :  { %1087 = vperm.xlu0 %1671, %v1760_v47   ;;  %v1762_v49 = vpop.eup %1761 }
 0x11e   :  { %1062 = vperm.xlu1 %1672, %v1758_v46   ;;  %v1764_v50 = vpop.eup %1763 }
 0x11f   :  { %v1766_v51 = vpop.eup %1765 }
 0x120   :  { %v1768_v52 = vpop.eup %1767 }
 0x122   :  { %880 = vperm.xlu1 %1672, %v1762_v49  }
 0x126   :  { %1072 = vperm.xlu1 %1672, %v1764_v50  }
 0x12a   :  { %890 = vperm.xlu1 %1672, %v1766_v51  }
 0x12d   :  { %v1615_v53 = vpop.f32.mrb[0].mxu1 }
 0x12e   :  { %1082 = vperm.xlu1 %1672, %v1768_v52   ;;  %v368_v54 = vpop.f32.mrb[1].mxu1 }
 0x12f   :  { %v1616_v55 = vpop.f32.mrb[2].mxu1 }
 0x130   :  { %v371_v56 = vpop.f32.mrb[3].mxu1 }
 0x135   :  { %v2103_v57 = vpop.f32.mrb[4].mxu1 }
 0x136   :  { %v2105_v58 = vpop.f32.mrb[5].mxu1 }
 0x137   :  { %v1620_v59 = vpop.f32.mrb[6].mxu1 }
 0x138   :  { %v387_v60 = vpop.f32.mrb[7].mxu1 }
 0x13d   :  { %v2107_v61 = vpop.f32.mrb[8].mxu1 }
 0x13e   :  { %v2109_v62 = vpop.f32.mrb[9].mxu1 }
 0x13f   :  { %v2111_v63 = vpop.f32.mrb[10].mxu1 }
 0x140   :  { %v2113_v0 = vpop.f32.mrb[11].mxu1 }
 0x145   :  { %v2115_v2 = vpop.f32.mrb[12].mxu1 }
 0x146   :  { %v2117_v4 = vpop.f32.mrb[13].mxu1 }
 0x147   :  { %v2119_v5 = vpop.f32.mrb[14].mxu1 }
 0x148   :  { %v2121_v6 = vpop.f32.mrb[15].mxu1 }
 0x14d   :  { %v1647_v7 = vpop.f32.mrb[16].mxu1 }
 0x14e   :  { %v640_v8 = vpop.f32.mrb[17].mxu1 }
 0x14f   :  { %v1648_v9 = vpop.f32.mrb[18].mxu1 }
 0x150   :  { %v643_v10 = vpop.f32.mrb[19].mxu1 }
 0x155   :  { %v2123_v11 = vpop.f32.mrb[20].mxu1 }
 0x156   :  { %v656_v12 = vpop.f32.mrb[21].mxu1 }
 0x157   :  { %v1652_v13 = vpop.f32.mrb[22].mxu1 }
 0x158   :  { %v659_v14 = vpop.f32.mrb[23].mxu1 }
 0x15d   :  { %v2125_v16 = vpop.f32.mrb[24].mxu1 }
 0x15e   :  { %v2127_v17 = vpop.f32.mrb[25].mxu1 }
 0x15f   :  { %v2129_v18 = vpop.f32.mrb[26].mxu1 }
 0x160   :  { %v675_v15 = vpop.f32.mrb[27].mxu1 }
 0x161   :  { %v821_v20 = vpop.permute.xlu0 %820 }
 0x162   :  { %v898_v24 = vmul.f32 %v821_v20, %v368_v54 }
 0x165   :  { %v826_v19 = vpop.permute.xlu1 %825  ;;  %v2131_v21 = vpop.f32.mrb[28].mxu1 }
 0x166   :  { %v2133_v26 = vpop.f32.mrb[29].mxu1  ;;  %v899_v32 = vmul.f32 %v826_v19, %v371_v56 }
 0x167   :  { %v2135_v28 = vpop.f32.mrb[30].mxu1 }
 0x168   :  { %v2137_v29 = vpop.f32.mrb[31].mxu1 }
 0x169   :  { %v1013_v22 = vpop.permute.xlu1 %1012 }
 0x16a   :  { %v1090_v25 = vmul.f32 %v1013_v22, %v640_v8 }
 0x16c   :  { %v1106_v27 = vadd.f32 %v1090_v25, %v898_v24 }
 0x16d   :  { %v1018_v31 = vpop.permute.xlu1 %1017 }
 0x16e   :  { %v1091_v33 = vmul.f32 %v1018_v31, %v643_v10  ;;  %v1129_v34 = vadd.f32 %v2142_v30, %v1106_v27 }
 0x170   :  { %v1107_v35 = vadd.f32 %v1091_v33, %v899_v32  ;;  %v846_v36 = vpop.permute.xlu0 %845  ;;  %v1145_v38 = vmax.f32 %v1129_v34, 0.0 }
 0x171   :  { %v831_v1 = vpop.permute.xlu1 %830  ;;  %v903_v41 = vmul.f32 %v846_v36, %v387_v60 }
 0x172   :  { %v1130_v37 = vadd.f32 %v2142_v30, %v1107_v35  ;;  %v900_v47 = vmul.f32 %v1615_v53, %v831_v1 }
 0x174   :  { %v1146_v23 = vmax.f32 %v1130_v37, 0.0  ;;  %v1038_v40 = vpop.permute.xlu0 %1037 }
 0x175   :  { %v836_v39 = vpop.permute.xlu1 %835  ;;  %v1095_v42 = vmul.f32 %v1038_v40, %v659_v14 }
 0x176   :  { %v1161_v43 = vpack.c.bf16 %v1146_v23, %v1145_v38  ;;  %v901_v52 = vmul.f32 %v1616_v55, %v836_v39 }
 0x177   :  { %v1111_v44 = vadd.f32 %v1095_v42, %v903_v41 }
 0x178   :  { %1298 = vmatmul.mubr.bf16.vlgmr.msra.gmra.mrb[0].mxu0 %v1161_v43  ;;  %v856_v46 = vpop.permute.xlu0 %855 }
 0x179   :  { %v1023_v45 = vpop.permute.xlu1 %1022  ;;  %1307 = vmatprep.mubr.bf16.mxu0 %v1871_v3  ;;  %v905_v54 = vmul.f32 %v1620_v59, %v856_v46 }
 0x17a   :  { %v1092_v48 = vmul.f32 %v1647_v7, %v1023_v45 }
 0x17c   :  { %v1108_v49 = vadd.f32 %v1092_v48, %v900_v47  ;;  %v1048_v51 = vpop.permute.xlu0 %1047 }
 0x17d   :  { %v1028_v50 = vpop.permute.xlu1 %1027  ;;  %v1097_v8 = vmul.f32 %v1652_v13, %v1048_v51  ;;  %v1134_v13 = vadd.f32 %v2142_v30, %v1111_v44 }
 0x17e   :  { %v1093_v56 = vmul.f32 %v1648_v9, %v1028_v50  ;;  %v1131_v10 = vadd.f32 %v2142_v30, %v1108_v49 }
 0x17f   :  { %v1113_v14 = vadd.f32 %v1097_v8, %v905_v54  ;;  %v1150_v36 = vmax.f32 %v1134_v13, 0.0 }
 0x180   :  { %v1109_v60 = vadd.f32 %v1093_v56, %v901_v52  ;;  %v866_v20 = vpop.permute.xlu0 %865  ;;  %v1147_v24 = vmax.f32 %v1131_v10, 0.0 }
 0x181   :  { %v841_v19 = vpop.permute.xlu1 %840  ;;  %v907_v31 = vmul.f32 %v866_v20, %v2113_v0  ;;  %v1136_v40 = vadd.f32 %v2142_v30, %v1113_v14 }
 0x182   :  { %v1132_v22 = vadd.f32 %v2142_v30, %v1109_v60  ;;  %v902_v53 = vmul.f32 %v841_v19, %v2105_v58 }
 0x183   :  { %v1152_v45 = vmax.f32 %v1136_v40, 0.0 }
 0x184   :  { %v1148_v25 = vmax.f32 %v1132_v22, 0.0  ;;  %v1058_v27 = vpop.permute.xlu0 %1057 }
 0x185   :  { %v1033_v7 = vpop.permute.xlu1 %1032  ;;  %v1099_v59 = vmul.f32 %v1058_v27, %v675_v15 }
 0x186   :  { %v1094_v55 = vmul.f32 %v1033_v7, %v656_v12  ;;  %v1162_v9 = vpack.c.bf16 %v1148_v25, %v1147_v24 }
 0x187   :  { %v1115_v33 = vadd.f32 %v1099_v59, %v907_v31 }
 0x188   :  { %v1110_v32 = vadd.f32 %v1094_v55, %v902_v53  ;;  %1308 = vmatmul.mubr.bf16.gmra.mrb[4].mxu0 %v1162_v9  ;;  %v876_v35 = vpop.permute.xlu0 %875 }
 0x189   :  { %v851_v34 = vpop.permute.xlu1 %850  ;;  %1317 = vmatprep.mubr.bf16.mxu0 %v1871_v3  ;;  %v909_v12 = vmul.f32 %v2111_v63, %v876_v35  ;;  %v1138_v51 = vadd.f32 %v2142_v30, %v1115_v33 }
 0x18a   :  { %v1133_v1 = vadd.f32 %v2142_v30, %v1110_v32  ;;  %v904_v37 = vmul.f32 %v2103_v57, %v851_v34 }
 0x18b   :  { %v1154_v10 = vmax.f32 %v1138_v51, 0.0 }
 0x18c   :  { %v1149_v58 = vmax.f32 %v1133_v1, 0.0  ;;  %v1068_v0 = vpop.permute.xlu0 %1067 }
 0x18d   :  { %v1043_v38 = vpop.permute.xlu1 %1042  ;;  %v1101_v23 = vmul.f32 %v2129_v18, %v1068_v0 }
 0x18e   :  { %v1096_v15 = vmul.f32 %v2123_v11, %v1043_v38  ;;  %v1163_v39 = vpack.c.bf16 %v1150_v36, %v1149_v58 }
 0x18f   :  { %v1117_v42 = vadd.f32 %v1101_v23, %v909_v12 }
 0x190   :  { %v1112_v41 = vadd.f32 %v1096_v15, %v904_v37  ;;  %1318 = vmatmul.mubr.bf16.gmra.mrb[8].mxu0 %v1163_v39  ;;  %v886_v44 = vpop.permute.xlu0 %885 }
 0x191   :  { %v861_v43 = vpop.permute.xlu1 %860  ;;  %1327 = vmatprep.mubr.bf16.mxu0 %v1871_v3  ;;  %v911_v18 = vmul.f32 %v886_v44, %v2121_v6  ;;  %v1140_v24 = vadd.f32 %v2142_v30, %v1117_v42 }
 0x192   :  { %v1135_v57 = vadd.f32 %v2142_v30, %v1112_v41  ;;  %v906_v63 = vmul.f32 %v861_v43, %v2109_v62 }
 0x193   :  { %v1156_v31 = vmax.f32 %v1140_v24, 0.0 }
 0x194   :  { %v1151_v46 = vmax.f32 %v1135_v57, 0.0  ;;  %v1078_v11 = vpop.permute.xlu0 %1077 }
 0x195   :  { %v1053_v47 = vpop.permute.xlu1 %1052  ;;  %v1103_v49 = vmul.f32 %v1078_v11, %v2137_v29 }
 0x196   :  { %v1098_v48 = vmul.f32 %v1053_v47, %v2127_v17  ;;  %v1164_v50 = vpack.c.bf16 %v1152_v45, %v1151_v46 }
 0x197   :  { %v1119_v54 = vadd.f32 %v1103_v49, %v911_v18 }
 0x198   :  { %v1114_v52 = vadd.f32 %v1098_v48, %v906_v63  ;;  %1328 = vmatmul.mubr.bf16.gmra.mrb[12].mxu0 %v1164_v50  ;;  %v896_v8 = vpop.permute.xlu0 %895 }
 0x199   :  { %v871_v56 = vpop.permute.xlu1 %870  ;;  %1337 = vmatprep.mubr.bf16.mxu0 %v1871_v3  ;;  %v913_v29 = vmul.f32 %v2119_v5, %v896_v8  ;;  %v1142_v9 = vadd.f32 %v2142_v30, %v1119_v54 }
 0x19a   :  { %v1137_v62 = vadd.f32 %v2142_v30, %v1114_v52  ;;  %v908_v6 = vmul.f32 %v2107_v61, %v871_v56 }
 0x19b   :  { %v1158_v34 = vmax.f32 %v1142_v9, 0.0 }
 0x19c   :  { %v1153_v60 = vmax.f32 %v1137_v62, 0.0  ;;  %v1088_v17 = vpop.permute.xlu0 %1087 }
 0x19d   :  { %v1063_v14 = vpop.permute.xlu1 %1062  ;;  %v1105_v20 = vmul.f32 %v2135_v28, %v1088_v17 }
 0x19e   :  { %v1100_v19 = vmul.f32 %v2125_v16, %v1063_v14  ;;  %v1165_v22 = vpack.c.bf16 %v1154_v10, %v1153_v60 }
 0x19f   :  { %v1121_v53 = vadd.f32 %v1105_v20, %v913_v29 }
 0x1a0   :  { %v1116_v25 = vadd.f32 %v1100_v19, %v908_v6  ;;  %1338 = vmatmul.mubr.bf16.gmra.mrb[16].mxu0 %v1165_v22 }
 0x1a1   :  { %v881_v7 = vpop.permute.xlu1 %880  ;;  %1347 = vmatprep.mubr.bf16.mxu0 %v1871_v3  ;;  %v1144_v61 = vadd.f32 %v2142_v30, %v1121_v53 }
 0x1a2   :  { %v1139_v27 = vadd.f32 %v2142_v30, %v1116_v25  ;;  %v910_v16 = vmul.f32 %v881_v7, %v2117_v4 }
 0x1a3   :  { %v1160_v38 = vmax.f32 %v1144_v61, 0.0 }
 0x1a4   :  { %v1155_v55 = vmax.f32 %v1139_v27, 0.0 }
 0x1a5   :  { %v1073_v5 = vpop.permute.xlu1 %1072 }
 0x1a6   :  { %v1102_v28 = vmul.f32 %v1073_v5, %v2133_v26  ;;  %v1166_v59 = vpack.c.bf16 %v1156_v31, %v1155_v55 }
 0x1a8   :  { %v1118_v13 = vadd.f32 %v1102_v28, %v910_v16  ;;  %1348 = vmatmul.mubr.bf16.gmra.mrb[20].mxu0 %v1166_v59 }
 0x1a9   :  { %v891_v32 = vpop.permute.xlu1 %890  ;;  %1357 = vmatprep.mubr.bf16.mxu0 %v1871_v3 }
 0x1aa   :  { %v1141_v33 = vadd.f32 %v2142_v30, %v1118_v13  ;;  %v912_v36 = vmul.f32 %v2115_v2, %v891_v32 }
 0x1ac   :  { %v1157_v35 = vmax.f32 %v1141_v33, 0.0 }
 0x1ad   :  { %v1083_v1 = vpop.permute.xlu1 %1082 }
 0x1ae   :  { %v1104_v58 = vmul.f32 %v2131_v21, %v1083_v1  ;;  %v1167_v4 = vpack.c.bf16 %v1158_v34, %v1157_v35 }
 0x1b0   :  { %v1120_v37 = vadd.f32 %v1104_v58, %v912_v36  ;;  %1358 = vmatmul.mubr.bf16.gmra.mrb[24].mxu0 %v1167_v4 }
 0x1b1   :  { %1367 = vmatprep.mubr.bf16.mxu0 %v1871_v3 }
 0x1b2   :  { %v1143_v26 = vadd.f32 %v2142_v30, %v1120_v37 }
 0x1b4   :  { %v1159_v0 = vmax.f32 %v1143_v26, 0.0 }
 0x1b6   :  { %v1168_v12 = vpack.c.bf16 %v1160_v38, %v1159_v0 }
 0x1b8   :  { %1368 = vmatmul.mubr.bf16.gmra.mrb[28].mxu0 %v1168_v12 }
 0x24b   :  { %v1299_v15 = vpop.f32.mrb[0].mxu0 }
 0x24c   :  { %v1301_v23 = vpop.f32.mrb[1].mxu0 }
 0x24d   :  { %v1549_v39 = vpack.c.bf16 %v1301_v23, %v1299_v15  ;;  %v1303_v40 = vpop.f32.mrb[2].mxu0 }
 0x24e   :  { %v1305_v41 = vpop.f32.mrb[3].mxu0 }
 0x24f   :  { %1474 = vst [vmem:[#allocation10] sm:$0xff] %v1549_v39  ;;  %v1550_v2 = vpack.c.bf16 %v1305_v41, %v1303_v40 }
 0x251   :  { %1475 = vst [vmem:[#allocation10 + $0x8] sm:$0xff] %v1550_v2 }
 0x25b   :  { %v1309_v21 = vpop.f32.mrb[4].mxu0 }
 0x25c   :  { %v1311_v42 = vpop.f32.mrb[5].mxu0 }
 0x25d   :  { %v1551_v43 = vpack.c.bf16 %v1311_v42, %v1309_v21  ;;  %v1313_v44 = vpop.f32.mrb[6].mxu0 }
 0x25e   :  { %v1315_v57 = vpop.f32.mrb[7].mxu0 }
 0x25f   :  { %1476 = vst [vmem:[#allocation10 + $0x10] sm:$0xff] %v1551_v43  ;;  %v1552_v3 = vpack.c.bf16 %v1315_v57, %v1313_v44 }
 0x261   :  { %1477 = vst [vmem:[#allocation10 + $0x18] sm:$0xff] %v1552_v3 }
 0x263   :  { %v1319_v30 = vpop.f32.mrb[8].mxu0 }
 0x264   :  { %v1321_v45 = vpop.f32.mrb[9].mxu0 }
 0x265   :  { %v1553_v46 = vpack.c.bf16 %v1321_v45, %v1319_v30  ;;  %v1323_v63 = vpop.f32.mrb[10].mxu0 }
 0x266   :  { %v1325_v47 = vpop.f32.mrb[11].mxu0 }
 0x267   :  { %1478 = vst [vmem:[#allocation10 + $0x20] sm:$0xff] %v1553_v46  ;;  %v1554_v11 = vpack.c.bf16 %v1325_v47, %v1323_v63 }
 0x269   :  { %1479 = vst [vmem:[#allocation10 + $0x28] sm:$0xff] %v1554_v11 }
 0x26b   :  { %v1329_v18 = vpop.f32.mrb[12].mxu0 }
 0x26c   :  { %v1331_v48 = vpop.f32.mrb[13].mxu0 }
 0x26d   :  { %v1555_v49 = vpack.c.bf16 %v1331_v48, %v1329_v18  ;;  %v1333_v50 = vpop.f32.mrb[14].mxu0 }
 0x26e   :  { %v1335_v51 = vpop.f32.mrb[15].mxu0 }
 0x26f   :  { %1480 = vst [vmem:[#allocation10 + $0x30] sm:$0xff] %v1555_v49  ;;  %v1556_v52 = vpack.c.bf16 %v1335_v51, %v1333_v50 }
 0x271   :  { %1481 = vst [vmem:[#allocation10 + $0x38] sm:$0xff] %v1556_v52 }
 0x273   :  { %v1339_v54 = vpop.f32.mrb[16].mxu0 }
 0x274   :  { %v1341_v56 = vpop.f32.mrb[17].mxu0 }
 0x275   :  { %v1557_v8 = vpack.c.bf16 %v1341_v56, %v1339_v54  ;;  %v1343_v62 = vpop.f32.mrb[18].mxu0 }
 0x276   :  { %v1345_v10 = vpop.f32.mrb[19].mxu0 }
 0x277   :  { %1482 = vst [vmem:[#allocation10 + $0x40] sm:$0xff] %v1557_v8  ;;  %v1558_v60 = vpack.c.bf16 %v1345_v10, %v1343_v62 }
 0x279   :  { %1483 = vst [vmem:[#allocation10 + $0x48] sm:$0xff] %v1558_v60 }
 0x27b   :  { %v1349_v6 = vpop.f32.mrb[20].mxu0 }
 0x27c   :  { %v1351_v14 = vpop.f32.mrb[21].mxu0 }
 0x27d   :  { %v1559_v17 = vpack.c.bf16 %v1351_v14, %v1349_v6  ;;  %v1353_v29 = vpop.f32.mrb[22].mxu0 }
 0x27e   :  { %v1355_v19 = vpop.f32.mrb[23].mxu0 }
 0x27f   :  { %1484 = vst [vmem:[#allocation10 + $0x50] sm:$0xff] %v1559_v17  ;;  %v1560_v20 = vpack.c.bf16 %v1355_v19, %v1353_v29 }
 0x281   :  { %1485 = vst [vmem:[#allocation10 + $0x58] sm:$0xff] %v1560_v20 }
 0x283   :  { %v1359_v22 = vpop.f32.mrb[24].mxu0 }
 0x284   :  { %v1361_v24 = vpop.f32.mrb[25].mxu0 }
 0x285   :  { %v1561_v25 = vpack.c.bf16 %v1361_v24, %v1359_v22  ;;  %v1363_v53 = vpop.f32.mrb[26].mxu0 }
 0x286   :  { %v1365_v7 = vpop.f32.mrb[27].mxu0 }
 0x287   :  { %1486 = vst [vmem:[#allocation10 + $0x60] sm:$0xff] %v1561_v25  ;;  %v1562_v27 = vpack.c.bf16 %v1365_v7, %v1363_v53 }
 0x289   :  { %1487 = vst [vmem:[#allocation10 + $0x68] sm:$0xff] %v1562_v27 }
 0x28b   :  { %v1369_v61 = vpop.f32.mrb[28].mxu0 }
 0x28c   :  { %v1371_v31 = vpop.f32.mrb[29].mxu0 }
 0x28d   :  { %v1563_v55 = vpack.c.bf16 %v1371_v31, %v1369_v61  ;;  %v1373_v5 = vpop.f32.mrb[30].mxu0 }
 0x28e   :  { %v1375_v16 = vpop.f32.mrb[31].mxu0 }
 0x28f   :  { %1488 = vst [vmem:[#allocation10 + $0x70] sm:$0xff] %v1563_v55  ;;  %v1564_v28 = vpack.c.bf16 %v1375_v16, %v1373_v5 }
 0x291   :  { %1489 = vst [vmem:[#allocation10 + $0x78] sm:$0xff] %v1564_v28 }
 0x292   :  { %1846 = shalt.err (!%p1843_p0)
}
 0x293   :  { %s1847_s6 = scalar_lea.hbm %s2204_s4, 2048 }
 0x294   :  { %p1848_p1 = scmp.ne.s32.totalorder %s2204_s4, %s1847_s6  ;;  %p1851_p2 = scmp.lt.u32.totalorder %s1847_s6, %s2204_s4 }
 0x296   :  { %p1853_p3 = pnand %p1851_p2, %p1848_p1 }
 0x298   :  { %1856 = shalt.err (!%p1853_p3)
}
 0x299   :  { %1501 = dma.vmem_to_hbm [thread:$0]  %s1496_s28, 2048, %s2204_s4, [#allocation6], %s1867_s1, %s1867_s1, %s1868_s13  }
 0x29a   :  { %1861 = dma.done.wait [#allocation6], 2048  }
 0x29b   :  { %1862 = vsyncadd [#allocation6], 4294965248 }
 0x29c   :  { %1505 = vsyncpa [#allocation5], 1 }
 0x29d   :  { %1506 = vsyncpa [#allocation8], 1 }
 0x29e   :  { %1507 = vsyncpa [#allocation6], 1 }

</bundles_post_ra>
